<compile_context>
chip_gen: v7x
topology: tpu7x:2x2x1
jax: 0.10.0
libtpu: 0.0.40
codegen_flags: <defaults>
</compile_context>

<pallas_src>
import functools

import jax
import jax.numpy as jnp
from jax.experimental import pallas as pl
from jax.experimental.pallas import tpu as pltpu


def _round_up(x, m):
    return (x + m - 1) // m * m


# ----------------------------- Pallas kernels -------------------------------

def conv_stats_kernel(xa_ref, xb_ref, w_ref, mask_ref,
                      out_ref, psum_ref, psumsq_ref, *, shifts, tile_n):
    """Shift-and-matmul 3-D conv for one (batch, spatial-tile) grid cell, with
    fused per-channel partial sums / sums-of-squares for the BatchNorm stats.

    xa_ref, xb_ref : (1, Cin, tile_n)   two adjacent lane-tiles of the
                     flattened (N, Cin, D*H*W) input; xb supplies the tap halo.
    w_ref          : (k^3, Cout, Cin)   per-tap weight slices (resident).
    mask_ref       : (1, tile_n)        1.0 at valid output voxels, else 0.0.
    out_ref        : (1, Cout, tile_n)  conv tile (channels-major, lane-dense).
    psum_ref / psumsq_ref : (1, 1, Cout, 1)  masked partial reductions.
    """
    cout = w_ref.shape[1]

    # Lane-contiguous slab covering flat positions [j*tile_n, (j+2)*tile_n).
    # All k^3 tap shifts are *static* lane offsets into this slab, so the raw
    # input is read once per tile (plus a halo block) instead of being
    # re-read 27x by an XLA-side im2col materialization.
    slab = jnp.concatenate([xa_ref[0], xb_ref[0]], axis=-1)  # (Cin, 2*tile_n)

    acc = jnp.zeros((cout, tile_n), jnp.float32)
    for t, s in enumerate(shifts):                # unrolled: shifts are static
        acc = acc + jnp.dot(w_ref[t], slab[:, s:s + tile_n],
                            preferred_element_type=jnp.float32)
    out_ref[0] = acc

    # BatchNorm partial statistics over valid voxels only (lane reduction of a
    # small (Cout, tile_n) register tile; garbage "full rows" are masked out).
    masked = acc * mask_ref[...]                  # (Cout, tile_n) * (1, tile_n)
    psum_ref[0, 0] = jnp.sum(masked, axis=1, keepdims=True)
    psumsq_ref[0, 0] = jnp.sum(masked * acc, axis=1, keepdims=True)


def bn_affine_relu_kernel(y_ref, scale_ref, shift_ref, o_ref):
    """Folded BatchNorm affine + ReLU on one lane-dense (Cout, tile_n) tile."""
    y = y_ref[0]
    o_ref[0] = jnp.maximum(y * scale_ref[...] + shift_ref[...], 0.0)
    # TODO(synk): Dropout3d with p > 0 (channel-wise random zeroing) not
    # implemented; the module default p=0.0 makes it the identity.


# ------------------------------- JAX wrapper ---------------------------------

def conv_block_forward(x_ncdhw, weight_oidhw, bias, gamma, beta,
                       *, kernel_size=3, eps=1e-6, tile_n=512):
    """ConvBlock forward. x: [N, Cin, D, H, W] -> [N, Cout, Do, Ho, Wo]."""
    k = kernel_size
    N, Cin, D, H, W = x_ncdhw.shape
    Cout = weight_oidhw.shape[0]
    Do, Ho, Wo = D - k + 1, H - k + 1, W - k + 1
    S = D * H * W

    # Tap shifts in the flattened (d*H*W + h*W + w) spatial index.
    shifts = [kd * H * W + kh * W + kw
              for kd in range(k) for kh in range(k) for kw in range(k)]
    halo = shifts[-1]
    tile_n = _round_up(tile_n, 128)
    tile_n = max(tile_n, _round_up(halo + 1, 128))   # halo must fit in one tile
    num_tiles = pl.cdiv(S, tile_n)
    s_out = num_tiles * tile_n          # padded flat output length
    s_in = (num_tiles + 1) * tile_n     # +1 tile so the halo block always exists

    # --- glue (no im2col): flatten spatial axis, zero-pad the lane dim ---
    xflat = x_ncdhw.reshape(N, Cin, S).astype(jnp.float32)
    xpad = jnp.pad(xflat, ((0, 0), (0, 0), (0, s_in - S)))

    # weight (Cout, Cin, kd, kh, kw) -> (k^3, Cout, Cin) per-tap slices.
    wtap = jnp.transpose(weight_oidhw, (2, 3, 4, 0, 1)).reshape(k ** 3, Cout, Cin)
    wtap = wtap.astype(jnp.float32)
    # The conv bias is a per-channel constant that the BatchNorm mean
    # subtraction cancels exactly -> drop it (dead work, verified vs reference).
    del bias

    # Validity mask of the "full rows" trick: flat index m = d*H*W + h*W + w is
    # a real output voxel iff d < Do, h < Ho, w < Wo (and m < S).
    m_idx = jnp.arange(s_out, dtype=jnp.int32)
    d_i = m_idx // (H * W)
    h_i = (m_idx // W) % H
    w_i = m_idx % W
    valid = (d_i < Do) & (h_i < Ho) & (w_i < Wo) & (m_idx < S)
    mask = valid.astype(jnp.float32).reshape(1, s_out)

    grid = (N, num_tiles)

    # --- kernel 1: conv (tap-shift matmuls) + fused BN partial statistics ---
    conv_full, psum, psumsq = pl.pallas_call(
        functools.partial(conv_stats_kernel, shifts=shifts, tile_n=tile_n),
        out_shape=(
            jax.ShapeDtypeStruct((N, Cout, s_out), jnp.float32),
            jax.ShapeDtypeStruct((N, num_tiles, Cout, 1), jnp.float32),
            jax.ShapeDtypeStruct((N, num_tiles, Cout, 1), jnp.float32),
        ),
        grid_spec=pltpu.PrefetchScalarGridSpec(
            num_scalar_prefetch=0,
            grid=grid,
            in_specs=[
                pl.BlockSpec((1, Cin, tile_n), lambda n, j: (n, 0, j)),
                pl.BlockSpec((1, Cin, tile_n), lambda n, j: (n, 0, j + 1)),
                pl.BlockSpec((k ** 3, Cout, Cin), lambda n, j: (0, 0, 0)),
                pl.BlockSpec((1, tile_n), lambda n, j: (0, j)),
            ],
            out_specs=[
                pl.BlockSpec((1, Cout, tile_n), lambda n, j: (n, 0, j)),
                pl.BlockSpec((1, 1, Cout, 1), lambda n, j: (n, j, 0, 0)),
                pl.BlockSpec((1, 1, Cout, 1), lambda n, j: (n, j, 0, 0)),
            ],
        ),
        compiler_params=pltpu.CompilerParams(
            dimension_semantics=("parallel", "parallel")),
    )(xpad, xpad, wtap, mask)

    # --- tiny glue reduction: fold batch stats into a per-channel affine ---
    count = jnp.float32(N * Do * Ho * Wo)
    ch_sum = jnp.sum(psum, axis=(0, 1, 3))
    ch_sumsq = jnp.sum(psumsq, axis=(0, 1, 3))
    mean = ch_sum / count
    var = jnp.maximum(ch_sumsq / count - mean * mean, 0.0)   # biased (PyTorch BN)
    inv = jax.lax.rsqrt(var + eps)
    g32 = gamma.astype(jnp.float32)
    scale = (g32 * inv).reshape(Cout, 1)
    shift = (beta.astype(jnp.float32) - mean * g32 * inv).reshape(Cout, 1)

    # --- kernel 2: BatchNorm affine + ReLU, tiled, lane-dense, fully parallel --
    y_full = pl.pallas_call(
        bn_affine_relu_kernel,
        out_shape=jax.ShapeDtypeStruct((N, Cout, s_out), jnp.float32),
        grid_spec=pltpu.PrefetchScalarGridSpec(
            num_scalar_prefetch=0,
            grid=grid,
            in_specs=[
                pl.BlockSpec((1, Cout, tile_n), lambda n, j: (n, 0, j)),
                pl.BlockSpec((Cout, 1), lambda n, j: (0, 0)),
                pl.BlockSpec((Cout, 1), lambda n, j: (0, 0)),
            ],
            out_specs=pl.BlockSpec((1, Cout, tile_n), lambda n, j: (n, 0, j)),
        ),
        compiler_params=pltpu.CompilerParams(
            dimension_semantics=("parallel", "parallel")),
    )(conv_full, scale, shift)

    # glue: drop padded / garbage "full rows" -> valid NCDHW conv output.
    y = y_full[:, :, :S].reshape(N, Cout, D, H, W)
    return y[:, :, :Do, :Ho, :Wo]


# ------------------------------- reference -----------------------------------

def conv_block_reference(x, w, b, gamma, beta, eps=1e-6):
    out = jax.lax.conv_general_dilated(
        x, w, window_strides=(1, 1, 1), padding="VALID",
        dimension_numbers=("NCDHW", "OIDHW", "NCDHW"),
        precision=jax.lax.Precision.HIGHEST)
    out = out + b.reshape(1, -1, 1, 1, 1)
    mean = out.mean(axis=(0, 2, 3, 4), keepdims=True)
    var = ((out - mean) ** 2).mean(axis=(0, 2, 3, 4), keepdims=True)
    out = (out - mean) * jax.lax.rsqrt(var + eps)
    out = out * gamma.reshape(1, -1, 1, 1, 1) + beta.reshape(1, -1, 1, 1, 1)
    return jnp.maximum(out, 0.0)


if __name__ == "__main__":
    # Small shapes: N=2, Cin=4, Cout=8, spatial 12^3, k=3 -> output 10^3.
    # Flattened spatial = 1728 -> 4 lane-tiles of 512 per batch (multi-tile +
    # halo path exercised).
    N, Cin, Cout, S, k = 2, 4, 8, 12, 3

    key = jax.random.PRNGKey(0)
    k_x, k_w, k_b, k_g, k_beta = jax.random.split(key, 5)
    x = jax.random.normal(k_x, (N, Cin, S, S, S), dtype=jnp.float32)
    weight = 0.1 * jax.random.normal(k_w, (Cout, Cin, k, k, k), dtype=jnp.float32)
    bias = 0.1 * jax.random.normal(k_b, (Cout,), dtype=jnp.float32)
    gamma = 1.0 + 0.1 * jax.random.normal(k_g, (Cout,), dtype=jnp.float32)
    beta = 0.1 * jax.random.normal(k_beta, (Cout,), dtype=jnp.float32)

    fwd = jax.jit(functools.partial(conv_block_forward, kernel_size=k))
    out = jax.block_until_ready(fwd(x, weight, bias, gamma, beta))

    ref = jax.block_until_ready(
        conv_block_reference(x, weight, bias, gamma, beta))
    assert out.shape == ref.shape == (N, Cout, S - k + 1, S - k + 1, S - k + 1)
    err = jnp.max(jnp.abs(out - ref))
    assert jnp.allclose(out, ref, atol=1e-3, rtol=1e-3), f"max abs err {err}"

    print("KERNEL_OK")
</pallas_src>

<mosaic_0001>
module attributes {stable_mosaic.version = 11 : i64} {
  func.func @conv_stats_kernel(%arg0: i32, %arg1: i32, %arg2: memref<1x4x512xf32, #tpu.memory_space<vmem>>, %arg3: memref<1x4x512xf32, #tpu.memory_space<vmem>>, %arg4: memref<27x8x4xf32, #tpu.memory_space<vmem>>, %arg5: memref<1x512xf32, #tpu.memory_space<vmem>>, %arg6: memref<1x8x512xf32, #tpu.memory_space<vmem>>, %arg7: memref<1x1x8x1xf32, #tpu.memory_space<vmem>>, %arg8: memref<1x1x8x1xf32, #tpu.memory_space<vmem>>) attributes {dimension_semantics = [#tpu.dimension_semantics<parallel>, #tpu.dimension_semantics<parallel>], iteration_bounds = array<i64: 2, 4>, scalar_prefetch = 0 : i64, scratch_operands = 0 : i64, tpu.core_type = #tpu.core_type<tc>, window_params = [{transform_indices = @transform_0, window_bounds = array<i64: 1, 4, 512>}, {transform_indices = @transform_1, window_bounds = array<i64: 1, 4, 512>}, {pipeline_mode = #tpu.pipeline_mode<synchronous>, transform_indices = @transform_2, window_bounds = array<i64: 27, 8, 4>}, {transform_indices = @transform_3, window_bounds = array<i64: 1, 512>}, {transform_indices = @transform_4, window_bounds = array<i64: 1, 8, 512>}, {transform_indices = @transform_5, window_bounds = array<i64: 1, 1, 8, 1>}, {transform_indices = @transform_6, window_bounds = array<i64: 1, 1, 8, 1>}]} {
    %c0 = arith.constant 0 : index
    %c0_0 = arith.constant 0 : index
    %c0_1 = arith.constant 0 : index
    %0 = vector.load %arg2[%c0, %c0_0, %c0_1] : memref<1x4x512xf32, #tpu.memory_space<vmem>>, vector<1x4x512xf32>
    %1 = vector.shape_cast %0 : vector<1x4x512xf32> to vector<4x512xf32>
    %c0_2 = arith.constant 0 : index
    %c0_3 = arith.constant 0 : index
    %c0_4 = arith.constant 0 : index
    %2 = vector.load %arg3[%c0_2, %c0_3, %c0_4] : memref<1x4x512xf32, #tpu.memory_space<vmem>>, vector<1x4x512xf32>
    %3 = vector.shape_cast %2 : vector<1x4x512xf32> to vector<4x512xf32>
    %4 = tpu.concatenate %1, %3 in 1 : vector<4x512xf32>, vector<4x512xf32> -> vector<4x1024xf32>
    %cst = arith.constant 0.000000e+00 : f32
    %5 = vector.broadcast %cst : f32 to vector<8x512xf32>
    %c0_5 = arith.constant 0 : index
    %c0_6 = arith.constant 0 : index
    %c0_7 = arith.constant 0 : index
    %6 = vector.load %arg4[%c0_5, %c0_6, %c0_7] : memref<27x8x4xf32, #tpu.memory_space<vmem>>, vector<1x8x4xf32>
    %7 = vector.shape_cast %6 : vector<1x8x4xf32> to vector<8x4xf32>
    %8 = vector.extract_strided_slice %4 {offsets = [0, 0], sizes = [4, 512], strides = [1, 1]} : vector<4x1024xf32> to vector<4x512xf32>
    %cst_8 = arith.constant dense<0.000000e+00> : vector<8x512xf32>
    %9 = tpu.matmul %7, %8, %cst_8 {dimension_numbers = #tpu.dot_dimension_numbers<[1], [0], [0], [1], [0, 0, 1, 1], [], []>} : vector<8x4xf32>, vector<4x512xf32>, vector<8x512xf32> -> vector<8x512xf32>
    %10 = arith.addf %5, %9 : vector<8x512xf32>
    %c1 = arith.constant 1 : index
    %c0_9 = arith.constant 0 : index
    %c0_10 = arith.constant 0 : index
    %11 = vector.load %arg4[%c1, %c0_9, %c0_10] : memref<27x8x4xf32, #tpu.memory_space<vmem>>, vector<1x8x4xf32>
    %12 = vector.shape_cast %11 : vector<1x8x4xf32> to vector<8x4xf32>
    %13 = vector.extract_strided_slice %4 {offsets = [0, 1], sizes = [4, 512], strides = [1, 1]} : vector<4x1024xf32> to vector<4x512xf32>
    %cst_11 = arith.constant dense<0.000000e+00> : vector<8x512xf32>
    %14 = tpu.matmul %12, %13, %cst_11 {dimension_numbers = #tpu.dot_dimension_numbers<[1], [0], [0], [1], [0, 0, 1, 1], [], []>} : vector<8x4xf32>, vector<4x512xf32>, vector<8x512xf32> -> vector<8x512xf32>
    %15 = arith.addf %10, %14 : vector<8x512xf32>
    %c2 = arith.constant 2 : index
    %c0_12 = arith.constant 0 : index
    %c0_13 = arith.constant 0 : index
    %16 = vector.load %arg4[%c2, %c0_12, %c0_13] : memref<27x8x4xf32, #tpu.memory_space<vmem>>, vector<1x8x4xf32>
    %17 = vector.shape_cast %16 : vector<1x8x4xf32> to vector<8x4xf32>
    %18 = vector.extract_strided_slice %4 {offsets = [0, 2], sizes = [4, 512], strides = [1, 1]} : vector<4x1024xf32> to vector<4x512xf32>
    %cst_14 = arith.constant dense<0.000000e+00> : vector<8x512xf32>
    %19 = tpu.matmul %17, %18, %cst_14 {dimension_numbers = #tpu.dot_dimension_numbers<[1], [0], [0], [1], [0, 0, 1, 1], [], []>} : vector<8x4xf32>, vector<4x512xf32>, vector<8x512xf32> -> vector<8x512xf32>
    %20 = arith.addf %15, %19 : vector<8x512xf32>
    %c3 = arith.constant 3 : index
    %c0_15 = arith.constant 0 : index
    %c0_16 = arith.constant 0 : index
    %21 = vector.load %arg4[%c3, %c0_15, %c0_16] : memref<27x8x4xf32, #tpu.memory_space<vmem>>, vector<1x8x4xf32>
    %22 = vector.shape_cast %21 : vector<1x8x4xf32> to vector<8x4xf32>
    %23 = vector.extract_strided_slice %4 {offsets = [0, 12], sizes = [4, 512], strides = [1, 1]} : vector<4x1024xf32> to vector<4x512xf32>
    %cst_17 = arith.constant dense<0.000000e+00> : vector<8x512xf32>
    %24 = tpu.matmul %22, %23, %cst_17 {dimension_numbers = #tpu.dot_dimension_numbers<[1], [0], [0], [1], [0, 0, 1, 1], [], []>} : vector<8x4xf32>, vector<4x512xf32>, vector<8x512xf32> -> vector<8x512xf32>
    %25 = arith.addf %20, %24 : vector<8x512xf32>
    %c4 = arith.constant 4 : index
    %c0_18 = arith.constant 0 : index
    %c0_19 = arith.constant 0 : index
    %26 = vector.load %arg4[%c4, %c0_18, %c0_19] : memref<27x8x4xf32, #tpu.memory_space<vmem>>, vector<1x8x4xf32>
    %27 = vector.shape_cast %26 : vector<1x8x4xf32> to vector<8x4xf32>
    %28 = vector.extract_strided_slice %4 {offsets = [0, 13], sizes = [4, 512], strides = [1, 1]} : vector<4x1024xf32> to vector<4x512xf32>
    %cst_20 = arith.constant dense<0.000000e+00> : vector<8x512xf32>
    %29 = tpu.matmul %27, %28, %cst_20 {dimension_numbers = #tpu.dot_dimension_numbers<[1], [0], [0], [1], [0, 0, 1, 1], [], []>} : vector<8x4xf32>, vector<4x512xf32>, vector<8x512xf32> -> vector<8x512xf32>
    %30 = arith.addf %25, %29 : vector<8x512xf32>
    %c5 = arith.constant 5 : index
    %c0_21 = arith.constant 0 : index
    %c0_22 = arith.constant 0 : index
    %31 = vector.load %arg4[%c5, %c0_21, %c0_22] : memref<27x8x4xf32, #tpu.memory_space<vmem>>, vector<1x8x4xf32>
    %32 = vector.shape_cast %31 : vector<1x8x4xf32> to vector<8x4xf32>
    %33 = vector.extract_strided_slice %4 {offsets = [0, 14], sizes = [4, 512], strides = [1, 1]} : vector<4x1024xf32> to vector<4x512xf32>
    %cst_23 = arith.constant dense<0.000000e+00> : vector<8x512xf32>
    %34 = tpu.matmul %32, %33, %cst_23 {dimension_numbers = #tpu.dot_dimension_numbers<[1], [0], [0], [1], [0, 0, 1, 1], [], []>} : vector<8x4xf32>, vector<4x512xf32>, vector<8x512xf32> -> vector<8x512xf32>
    %35 = arith.addf %30, %34 : vector<8x512xf32>
    %c6 = arith.constant 6 : index
    %c0_24 = arith.constant 0 : index
    %c0_25 = arith.constant 0 : index
    %36 = vector.load %arg4[%c6, %c0_24, %c0_25] : memref<27x8x4xf32, #tpu.memory_space<vmem>>, vector<1x8x4xf32>
    %37 = vector.shape_cast %36 : vector<1x8x4xf32> to vector<8x4xf32>
    %38 = vector.extract_strided_slice %4 {offsets = [0, 24], sizes = [4, 512], strides = [1, 1]} : vector<4x1024xf32> to vector<4x512xf32>
    %cst_26 = arith.constant dense<0.000000e+00> : vector<8x512xf32>
    %39 = tpu.matmul %37, %38, %cst_26 {dimension_numbers = #tpu.dot_dimension_numbers<[1], [0], [0], [1], [0, 0, 1, 1], [], []>} : vector<8x4xf32>, vector<4x512xf32>, vector<8x512xf32> -> vector<8x512xf32>
    %40 = arith.addf %35, %39 : vector<8x512xf32>
    %c7 = arith.constant 7 : index
    %c0_27 = arith.constant 0 : index
    %c0_28 = arith.constant 0 : index
    %41 = vector.load %arg4[%c7, %c0_27, %c0_28] : memref<27x8x4xf32, #tpu.memory_space<vmem>>, vector<1x8x4xf32>
    %42 = vector.shape_cast %41 : vector<1x8x4xf32> to vector<8x4xf32>
    %43 = vector.extract_strided_slice %4 {offsets = [0, 25], sizes = [4, 512], strides = [1, 1]} : vector<4x1024xf32> to vector<4x512xf32>
    %cst_29 = arith.constant dense<0.000000e+00> : vector<8x512xf32>
    %44 = tpu.matmul %42, %43, %cst_29 {dimension_numbers = #tpu.dot_dimension_numbers<[1], [0], [0], [1], [0, 0, 1, 1], [], []>} : vector<8x4xf32>, vector<4x512xf32>, vector<8x512xf32> -> vector<8x512xf32>
    %45 = arith.addf %40, %44 : vector<8x512xf32>
    %c8 = arith.constant 8 : index
    %c0_30 = arith.constant 0 : index
    %c0_31 = arith.constant 0 : index
    %46 = vector.load %arg4[%c8, %c0_30, %c0_31] : memref<27x8x4xf32, #tpu.memory_space<vmem>>, vector<1x8x4xf32>
    %47 = vector.shape_cast %46 : vector<1x8x4xf32> to vector<8x4xf32>
    %48 = vector.extract_strided_slice %4 {offsets = [0, 26], sizes = [4, 512], strides = [1, 1]} : vector<4x1024xf32> to vector<4x512xf32>
    %cst_32 = arith.constant dense<0.000000e+00> : vector<8x512xf32>
    %49 = tpu.matmul %47, %48, %cst_32 {dimension_numbers = #tpu.dot_dimension_numbers<[1], [0], [0], [1], [0, 0, 1, 1], [], []>} : vector<8x4xf32>, vector<4x512xf32>, vector<8x512xf32> -> vector<8x512xf32>
    %50 = arith.addf %45, %49 : vector<8x512xf32>
    %c9 = arith.constant 9 : index
    %c0_33 = arith.constant 0 : index
    %c0_34 = arith.constant 0 : index
    %51 = vector.load %arg4[%c9, %c0_33, %c0_34] : memref<27x8x4xf32, #tpu.memory_space<vmem>>, vector<1x8x4xf32>
    %52 = vector.shape_cast %51 : vector<1x8x4xf32> to vector<8x4xf32>
    %53 = vector.extract_strided_slice %4 {offsets = [0, 144], sizes = [4, 512], strides = [1, 1]} : vector<4x1024xf32> to vector<4x512xf32>
    %cst_35 = arith.constant dense<0.000000e+00> : vector<8x512xf32>
    %54 = tpu.matmul %52, %53, %cst_35 {dimension_numbers = #tpu.dot_dimension_numbers<[1], [0], [0], [1], [0, 0, 1, 1], [], []>} : vector<8x4xf32>, vector<4x512xf32>, vector<8x512xf32> -> vector<8x512xf32>
    %55 = arith.addf %50, %54 : vector<8x512xf32>
    %c10 = arith.constant 10 : index
    %c0_36 = arith.constant 0 : index
    %c0_37 = arith.constant 0 : index
    %56 = vector.load %arg4[%c10, %c0_36, %c0_37] : memref<27x8x4xf32, #tpu.memory_space<vmem>>, vector<1x8x4xf32>
    %57 = vector.shape_cast %56 : vector<1x8x4xf32> to vector<8x4xf32>
    %58 = vector.extract_strided_slice %4 {offsets = [0, 145], sizes = [4, 512], strides = [1, 1]} : vector<4x1024xf32> to vector<4x512xf32>
    %cst_38 = arith.constant dense<0.000000e+00> : vector<8x512xf32>
    %59 = tpu.matmul %57, %58, %cst_38 {dimension_numbers = #tpu.dot_dimension_numbers<[1], [0], [0], [1], [0, 0, 1, 1], [], []>} : vector<8x4xf32>, vector<4x512xf32>, vector<8x512xf32> -> vector<8x512xf32>
    %60 = arith.addf %55, %59 : vector<8x512xf32>
    %c11 = arith.constant 11 : index
    %c0_39 = arith.constant 0 : index
    %c0_40 = arith.constant 0 : index
    %61 = vector.load %arg4[%c11, %c0_39, %c0_40] : memref<27x8x4xf32, #tpu.memory_space<vmem>>, vector<1x8x4xf32>
    %62 = vector.shape_cast %61 : vector<1x8x4xf32> to vector<8x4xf32>
    %63 = vector.extract_strided_slice %4 {offsets = [0, 146], sizes = [4, 512], strides = [1, 1]} : vector<4x1024xf32> to vector<4x512xf32>
    %cst_41 = arith.constant dense<0.000000e+00> : vector<8x512xf32>
    %64 = tpu.matmul %62, %63, %cst_41 {dimension_numbers = #tpu.dot_dimension_numbers<[1], [0], [0], [1], [0, 0, 1, 1], [], []>} : vector<8x4xf32>, vector<4x512xf32>, vector<8x512xf32> -> vector<8x512xf32>
    %65 = arith.addf %60, %64 : vector<8x512xf32>
    %c12 = arith.constant 12 : index
    %c0_42 = arith.constant 0 : index
    %c0_43 = arith.constant 0 : index
    %66 = vector.load %arg4[%c12, %c0_42, %c0_43] : memref<27x8x4xf32, #tpu.memory_space<vmem>>, vector<1x8x4xf32>
    %67 = vector.shape_cast %66 : vector<1x8x4xf32> to vector<8x4xf32>
    %68 = vector.extract_strided_slice %4 {offsets = [0, 156], sizes = [4, 512], strides = [1, 1]} : vector<4x1024xf32> to vector<4x512xf32>
    %cst_44 = arith.constant dense<0.000000e+00> : vector<8x512xf32>
    %69 = tpu.matmul %67, %68, %cst_44 {dimension_numbers = #tpu.dot_dimension_numbers<[1], [0], [0], [1], [0, 0, 1, 1], [], []>} : vector<8x4xf32>, vector<4x512xf32>, vector<8x512xf32> -> vector<8x512xf32>
    %70 = arith.addf %65, %69 : vector<8x512xf32>
    %c13 = arith.constant 13 : index
    %c0_45 = arith.constant 0 : index
    %c0_46 = arith.constant 0 : index
    %71 = vector.load %arg4[%c13, %c0_45, %c0_46] : memref<27x8x4xf32, #tpu.memory_space<vmem>>, vector<1x8x4xf32>
    %72 = vector.shape_cast %71 : vector<1x8x4xf32> to vector<8x4xf32>
    %73 = vector.extract_strided_slice %4 {offsets = [0, 157], sizes = [4, 512], strides = [1, 1]} : vector<4x1024xf32> to vector<4x512xf32>
    %cst_47 = arith.constant dense<0.000000e+00> : vector<8x512xf32>
    %74 = tpu.matmul %72, %73, %cst_47 {dimension_numbers = #tpu.dot_dimension_numbers<[1], [0], [0], [1], [0, 0, 1, 1], [], []>} : vector<8x4xf32>, vector<4x512xf32>, vector<8x512xf32> -> vector<8x512xf32>
    %75 = arith.addf %70, %74 : vector<8x512xf32>
    %c14 = arith.constant 14 : index
    %c0_48 = arith.constant 0 : index
    %c0_49 = arith.constant 0 : index
    %76 = vector.load %arg4[%c14, %c0_48, %c0_49] : memref<27x8x4xf32, #tpu.memory_space<vmem>>, vector<1x8x4xf32>
    %77 = vector.shape_cast %76 : vector<1x8x4xf32> to vector<8x4xf32>
    %78 = vector.extract_strided_slice %4 {offsets = [0, 158], sizes = [4, 512], strides = [1, 1]} : vector<4x1024xf32> to vector<4x512xf32>
    %cst_50 = arith.constant dense<0.000000e+00> : vector<8x512xf32>
    %79 = tpu.matmul %77, %78, %cst_50 {dimension_numbers = #tpu.dot_dimension_numbers<[1], [0], [0], [1], [0, 0, 1, 1], [], []>} : vector<8x4xf32>, vector<4x512xf32>, vector<8x512xf32> -> vector<8x512xf32>
    %80 = arith.addf %75, %79 : vector<8x512xf32>
    %c15 = arith.constant 15 : index
    %c0_51 = arith.constant 0 : index
    %c0_52 = arith.constant 0 : index
    %81 = vector.load %arg4[%c15, %c0_51, %c0_52] : memref<27x8x4xf32, #tpu.memory_space<vmem>>, vector<1x8x4xf32>
    %82 = vector.shape_cast %81 : vector<1x8x4xf32> to vector<8x4xf32>
    %83 = vector.extract_strided_slice %4 {offsets = [0, 168], sizes = [4, 512], strides = [1, 1]} : vector<4x1024xf32> to vector<4x512xf32>
    %cst_53 = arith.constant dense<0.000000e+00> : vector<8x512xf32>
    %84 = tpu.matmul %82, %83, %cst_53 {dimension_numbers = #tpu.dot_dimension_numbers<[1], [0], [0], [1], [0, 0, 1, 1], [], []>} : vector<8x4xf32>, vector<4x512xf32>, vector<8x512xf32> -> vector<8x512xf32>
    %85 = arith.addf %80, %84 : vector<8x512xf32>
    %c16 = arith.constant 16 : index
    %c0_54 = arith.constant 0 : index
    %c0_55 = arith.constant 0 : index
    %86 = vector.load %arg4[%c16, %c0_54, %c0_55] : memref<27x8x4xf32, #tpu.memory_space<vmem>>, vector<1x8x4xf32>
    %87 = vector.shape_cast %86 : vector<1x8x4xf32> to vector<8x4xf32>
    %88 = vector.extract_strided_slice %4 {offsets = [0, 169], sizes = [4, 512], strides = [1, 1]} : vector<4x1024xf32> to vector<4x512xf32>
    %cst_56 = arith.constant dense<0.000000e+00> : vector<8x512xf32>
    %89 = tpu.matmul %87, %88, %cst_56 {dimension_numbers = #tpu.dot_dimension_numbers<[1], [0], [0], [1], [0, 0, 1, 1], [], []>} : vector<8x4xf32>, vector<4x512xf32>, vector<8x512xf32> -> vector<8x512xf32>
    %90 = arith.addf %85, %89 : vector<8x512xf32>
    %c17 = arith.constant 17 : index
    %c0_57 = arith.constant 0 : index
    %c0_58 = arith.constant 0 : index
    %91 = vector.load %arg4[%c17, %c0_57, %c0_58] : memref<27x8x4xf32, #tpu.memory_space<vmem>>, vector<1x8x4xf32>
    %92 = vector.shape_cast %91 : vector<1x8x4xf32> to vector<8x4xf32>
    %93 = vector.extract_strided_slice %4 {offsets = [0, 170], sizes = [4, 512], strides = [1, 1]} : vector<4x1024xf32> to vector<4x512xf32>
    %cst_59 = arith.constant dense<0.000000e+00> : vector<8x512xf32>
    %94 = tpu.matmul %92, %93, %cst_59 {dimension_numbers = #tpu.dot_dimension_numbers<[1], [0], [0], [1], [0, 0, 1, 1], [], []>} : vector<8x4xf32>, vector<4x512xf32>, vector<8x512xf32> -> vector<8x512xf32>
    %95 = arith.addf %90, %94 : vector<8x512xf32>
    %c18 = arith.constant 18 : index
    %c0_60 = arith.constant 0 : index
    %c0_61 = arith.constant 0 : index
    %96 = vector.load %arg4[%c18, %c0_60, %c0_61] : memref<27x8x4xf32, #tpu.memory_space<vmem>>, vector<1x8x4xf32>
    %97 = vector.shape_cast %96 : vector<1x8x4xf32> to vector<8x4xf32>
    %98 = vector.extract_strided_slice %4 {offsets = [0, 288], sizes = [4, 512], strides = [1, 1]} : vector<4x1024xf32> to vector<4x512xf32>
    %cst_62 = arith.constant dense<0.000000e+00> : vector<8x512xf32>
    %99 = tpu.matmul %97, %98, %cst_62 {dimension_numbers = #tpu.dot_dimension_numbers<[1], [0], [0], [1], [0, 0, 1, 1], [], []>} : vector<8x4xf32>, vector<4x512xf32>, vector<8x512xf32> -> vector<8x512xf32>
    %100 = arith.addf %95, %99 : vector<8x512xf32>
    %c19 = arith.constant 19 : index
    %c0_63 = arith.constant 0 : index
    %c0_64 = arith.constant 0 : index
    %101 = vector.load %arg4[%c19, %c0_63, %c0_64] : memref<27x8x4xf32, #tpu.memory_space<vmem>>, vector<1x8x4xf32>
    %102 = vector.shape_cast %101 : vector<1x8x4xf32> to vector<8x4xf32>
    %103 = vector.extract_strided_slice %4 {offsets = [0, 289], sizes = [4, 512], strides = [1, 1]} : vector<4x1024xf32> to vector<4x512xf32>
    %cst_65 = arith.constant dense<0.000000e+00> : vector<8x512xf32>
    %104 = tpu.matmul %102, %103, %cst_65 {dimension_numbers = #tpu.dot_dimension_numbers<[1], [0], [0], [1], [0, 0, 1, 1], [], []>} : vector<8x4xf32>, vector<4x512xf32>, vector<8x512xf32> -> vector<8x512xf32>
    %105 = arith.addf %100, %104 : vector<8x512xf32>
    %c20 = arith.constant 20 : index
    %c0_66 = arith.constant 0 : index
    %c0_67 = arith.constant 0 : index
    %106 = vector.load %arg4[%c20, %c0_66, %c0_67] : memref<27x8x4xf32, #tpu.memory_space<vmem>>, vector<1x8x4xf32>
    %107 = vector.shape_cast %106 : vector<1x8x4xf32> to vector<8x4xf32>
    %108 = vector.extract_strided_slice %4 {offsets = [0, 290], sizes = [4, 512], strides = [1, 1]} : vector<4x1024xf32> to vector<4x512xf32>
    %cst_68 = arith.constant dense<0.000000e+00> : vector<8x512xf32>
    %109 = tpu.matmul %107, %108, %cst_68 {dimension_numbers = #tpu.dot_dimension_numbers<[1], [0], [0], [1], [0, 0, 1, 1], [], []>} : vector<8x4xf32>, vector<4x512xf32>, vector<8x512xf32> -> vector<8x512xf32>
    %110 = arith.addf %105, %109 : vector<8x512xf32>
    %c21 = arith.constant 21 : index
    %c0_69 = arith.constant 0 : index
    %c0_70 = arith.constant 0 : index
    %111 = vector.load %arg4[%c21, %c0_69, %c0_70] : memref<27x8x4xf32, #tpu.memory_space<vmem>>, vector<1x8x4xf32>
    %112 = vector.shape_cast %111 : vector<1x8x4xf32> to vector<8x4xf32>
    %113 = vector.extract_strided_slice %4 {offsets = [0, 300], sizes = [4, 512], strides = [1, 1]} : vector<4x1024xf32> to vector<4x512xf32>
    %cst_71 = arith.constant dense<0.000000e+00> : vector<8x512xf32>
    %114 = tpu.matmul %112, %113, %cst_71 {dimension_numbers = #tpu.dot_dimension_numbers<[1], [0], [0], [1], [0, 0, 1, 1], [], []>} : vector<8x4xf32>, vector<4x512xf32>, vector<8x512xf32> -> vector<8x512xf32>
    %115 = arith.addf %110, %114 : vector<8x512xf32>
    %c22 = arith.constant 22 : index
    %c0_72 = arith.constant 0 : index
    %c0_73 = arith.constant 0 : index
    %116 = vector.load %arg4[%c22, %c0_72, %c0_73] : memref<27x8x4xf32, #tpu.memory_space<vmem>>, vector<1x8x4xf32>
    %117 = vector.shape_cast %116 : vector<1x8x4xf32> to vector<8x4xf32>
    %118 = vector.extract_strided_slice %4 {offsets = [0, 301], sizes = [4, 512], strides = [1, 1]} : vector<4x1024xf32> to vector<4x512xf32>
    %cst_74 = arith.constant dense<0.000000e+00> : vector<8x512xf32>
    %119 = tpu.matmul %117, %118, %cst_74 {dimension_numbers = #tpu.dot_dimension_numbers<[1], [0], [0], [1], [0, 0, 1, 1], [], []>} : vector<8x4xf32>, vector<4x512xf32>, vector<8x512xf32> -> vector<8x512xf32>
    %120 = arith.addf %115, %119 : vector<8x512xf32>
    %c23 = arith.constant 23 : index
    %c0_75 = arith.constant 0 : index
    %c0_76 = arith.constant 0 : index
    %121 = vector.load %arg4[%c23, %c0_75, %c0_76] : memref<27x8x4xf32, #tpu.memory_space<vmem>>, vector<1x8x4xf32>
    %122 = vector.shape_cast %121 : vector<1x8x4xf32> to vector<8x4xf32>
    %123 = vector.extract_strided_slice %4 {offsets = [0, 302], sizes = [4, 512], strides = [1, 1]} : vector<4x1024xf32> to vector<4x512xf32>
    %cst_77 = arith.constant dense<0.000000e+00> : vector<8x512xf32>
    %124 = tpu.matmul %122, %123, %cst_77 {dimension_numbers = #tpu.dot_dimension_numbers<[1], [0], [0], [1], [0, 0, 1, 1], [], []>} : vector<8x4xf32>, vector<4x512xf32>, vector<8x512xf32> -> vector<8x512xf32>
    %125 = arith.addf %120, %124 : vector<8x512xf32>
    %c24 = arith.constant 24 : index
    %c0_78 = arith.constant 0 : index
    %c0_79 = arith.constant 0 : index
    %126 = vector.load %arg4[%c24, %c0_78, %c0_79] : memref<27x8x4xf32, #tpu.memory_space<vmem>>, vector<1x8x4xf32>
    %127 = vector.shape_cast %126 : vector<1x8x4xf32> to vector<8x4xf32>
    %128 = vector.extract_strided_slice %4 {offsets = [0, 312], sizes = [4, 512], strides = [1, 1]} : vector<4x1024xf32> to vector<4x512xf32>
    %cst_80 = arith.constant dense<0.000000e+00> : vector<8x512xf32>
    %129 = tpu.matmul %127, %128, %cst_80 {dimension_numbers = #tpu.dot_dimension_numbers<[1], [0], [0], [1], [0, 0, 1, 1], [], []>} : vector<8x4xf32>, vector<4x512xf32>, vector<8x512xf32> -> vector<8x512xf32>
    %130 = arith.addf %125, %129 : vector<8x512xf32>
    %c25 = arith.constant 25 : index
    %c0_81 = arith.constant 0 : index
    %c0_82 = arith.constant 0 : index
    %131 = vector.load %arg4[%c25, %c0_81, %c0_82] : memref<27x8x4xf32, #tpu.memory_space<vmem>>, vector<1x8x4xf32>
    %132 = vector.shape_cast %131 : vector<1x8x4xf32> to vector<8x4xf32>
    %133 = vector.extract_strided_slice %4 {offsets = [0, 313], sizes = [4, 512], strides = [1, 1]} : vector<4x1024xf32> to vector<4x512xf32>
    %cst_83 = arith.constant dense<0.000000e+00> : vector<8x512xf32>
    %134 = tpu.matmul %132, %133, %cst_83 {dimension_numbers = #tpu.dot_dimension_numbers<[1], [0], [0], [1], [0, 0, 1, 1], [], []>} : vector<8x4xf32>, vector<4x512xf32>, vector<8x512xf32> -> vector<8x512xf32>
    %135 = arith.addf %130, %134 : vector<8x512xf32>
    %c26 = arith.constant 26 : index
    %c0_84 = arith.constant 0 : index
    %c0_85 = arith.constant 0 : index
    %136 = vector.load %arg4[%c26, %c0_84, %c0_85] : memref<27x8x4xf32, #tpu.memory_space<vmem>>, vector<1x8x4xf32>
    %137 = vector.shape_cast %136 : vector<1x8x4xf32> to vector<8x4xf32>
    %138 = vector.extract_strided_slice %4 {offsets = [0, 314], sizes = [4, 512], strides = [1, 1]} : vector<4x1024xf32> to vector<4x512xf32>
    %cst_86 = arith.constant dense<0.000000e+00> : vector<8x512xf32>
    %139 = tpu.matmul %137, %138, %cst_86 {dimension_numbers = #tpu.dot_dimension_numbers<[1], [0], [0], [1], [0, 0, 1, 1], [], []>} : vector<8x4xf32>, vector<4x512xf32>, vector<8x512xf32> -> vector<8x512xf32>
    %140 = arith.addf %135, %139 : vector<8x512xf32>
    %c0_87 = arith.constant 0 : index
    %c0_88 = arith.constant 0 : index
    %c0_89 = arith.constant 0 : index
    %141 = vector.load %arg6[%c0_87, %c0_88, %c0_89] : memref<1x8x512xf32, #tpu.memory_space<vmem>>, vector<1x8x512xf32>
    %142 = vector.shape_cast %141 : vector<1x8x512xf32> to vector<8x512xf32>
    %143 = vector.shape_cast %140 : vector<8x512xf32> to vector<1x8x512xf32>
    tpu.vector_store %arg6[%c0_87, %c0_88, %c0_89], %143 {strides = array<i32>} : memref<1x8x512xf32, #tpu.memory_space<vmem>>, vector<1x8x512xf32>,
    %c0_90 = arith.constant 0 : index
    %c0_91 = arith.constant 0 : index
    %144 = vector.load %arg5[%c0_90, %c0_91] : memref<1x512xf32, #tpu.memory_space<vmem>>, vector<1x512xf32>
    %145 = vector.broadcast %144 : vector<1x512xf32> to vector<8x512xf32>
    %146 = arith.mulf %140, %145 : vector<8x512xf32>
    %cst_92 = arith.constant dense<0.000000e+00> : vector<8xf32>
    %147 = vector.multi_reduction <add>, %146, %cst_92 [1] : vector<8x512xf32> to vector<8xf32>
    %148 = vector.shape_cast %147 : vector<8xf32> to vector<8x1xf32>
    %c0_93 = arith.constant 0 : index
    %c0_94 = arith.constant 0 : index
    %c0_95 = arith.constant 0 : index
    %c0_96 = arith.constant 0 : index
    %149 = vector.load %arg7[%c0_93, %c0_94, %c0_95, %c0_96] : memref<1x1x8x1xf32, #tpu.memory_space<vmem>>, vector<1x1x8x1xf32>
    %150 = vector.shape_cast %149 : vector<1x1x8x1xf32> to vector<8x1xf32>
    %151 = vector.shape_cast %148 : vector<8x1xf32> to vector<1x1x8x1xf32>
    tpu.vector_store %arg7[%c0_93, %c0_94, %c0_95, %c0_96], %151 {strides = array<i32>} : memref<1x1x8x1xf32, #tpu.memory_space<vmem>>, vector<1x1x8x1xf32>,
    %152 = arith.mulf %146, %140 : vector<8x512xf32>
    %cst_97 = arith.constant dense<0.000000e+00> : vector<8xf32>
    %153 = vector.multi_reduction <add>, %152, %cst_97 [1] : vector<8x512xf32> to vector<8xf32>
    %154 = vector.shape_cast %153 : vector<8xf32> to vector<8x1xf32>
    %c0_98 = arith.constant 0 : index
    %c0_99 = arith.constant 0 : index
    %c0_100 = arith.constant 0 : index
    %c0_101 = arith.constant 0 : index
    %155 = vector.load %arg8[%c0_98, %c0_99, %c0_100, %c0_101] : memref<1x1x8x1xf32, #tpu.memory_space<vmem>>, vector<1x1x8x1xf32>
    %156 = vector.shape_cast %155 : vector<1x1x8x1xf32> to vector<8x1xf32>
    %157 = vector.shape_cast %154 : vector<8x1xf32> to vector<1x1x8x1xf32>
    tpu.vector_store %arg8[%c0_98, %c0_99, %c0_100, %c0_101], %157 {strides = array<i32>} : memref<1x1x8x1xf32, #tpu.memory_space<vmem>>, vector<1x1x8x1xf32>,
    return
  }
  func.func @transform_0(%arg0: i32, %arg1: i32) -> (i32, i32, i32) {
    %c0_i32 = arith.constant 0 : i32
    %c0_i32_0 = arith.constant 0 : i32
    return %arg0, %c0_i32, %arg1 : i32, i32, i32
  }
  func.func @transform_1(%arg0: i32, %arg1: i32) -> (i32, i32, i32) {
    %c1_i32 = arith.constant 1 : i32
    %0 = arith.addi %arg1, %c1_i32 : i32
    %c0_i32 = arith.constant 0 : i32
    %c0_i32_0 = arith.constant 0 : i32
    return %arg0, %c0_i32, %0 : i32, i32, i32
  }
  func.func @transform_2(%arg0: i32, %arg1: i32) -> (i32, i32, i32) {
    %c0_i32 = arith.constant 0 : i32
    %c0_i32_0 = arith.constant 0 : i32
    %c0_i32_1 = arith.constant 0 : i32
    %c0_i32_2 = arith.constant 0 : i32
    return %c0_i32, %c0_i32_0, %c0_i32_1 : i32, i32, i32
  }
  func.func @transform_3(%arg0: i32, %arg1: i32) -> (i32, i32) {
    %c0_i32 = arith.constant 0 : i32
    %c0_i32_0 = arith.constant 0 : i32
    return %c0_i32, %arg1 : i32, i32
  }
  func.func @transform_4(%arg0: i32, %arg1: i32) -> (i32, i32, i32) {
    %c0_i32 = arith.constant 0 : i32
    %c0_i32_0 = arith.constant 0 : i32
    return %arg0, %c0_i32, %arg1 : i32, i32, i32
  }
  func.func @transform_5(%arg0: i32, %arg1: i32) -> (i32, i32, i32, i32) {
    %c0_i32 = arith.constant 0 : i32
    %c0_i32_0 = arith.constant 0 : i32
    %c0_i32_1 = arith.constant 0 : i32
    return %arg0, %arg1, %c0_i32, %c0_i32_0 : i32, i32, i32, i32
  }
  func.func @transform_6(%arg0: i32, %arg1: i32) -> (i32, i32, i32, i32) {
    %c0_i32 = arith.constant 0 : i32
    %c0_i32_0 = arith.constant 0 : i32
    %c0_i32_1 = arith.constant 0 : i32
    return %arg0, %arg1, %c0_i32, %c0_i32_0 : i32, i32, i32, i32
  }
}

module attributes {stable_mosaic.version = 11 : i64} {
  func.func @bn_affine_relu_kernel(%arg0: i32, %arg1: i32, %arg2: memref<1x8x512xf32, #tpu.memory_space<vmem>>, %arg3: memref<8x1xf32, #tpu.memory_space<vmem>>, %arg4: memref<8x1xf32, #tpu.memory_space<vmem>>, %arg5: memref<1x8x512xf32, #tpu.memory_space<vmem>>) attributes {dimension_semantics = [#tpu.dimension_semantics<parallel>, #tpu.dimension_semantics<parallel>], iteration_bounds = array<i64: 2, 4>, scalar_prefetch = 0 : i64, scratch_operands = 0 : i64, tpu.core_type = #tpu.core_type<tc>, window_params = [{transform_indices = @transform_0, window_bounds = array<i64: 1, 8, 512>}, {pipeline_mode = #tpu.pipeline_mode<synchronous>, transform_indices = @transform_1, window_bounds = array<i64: 8, 1>}, {pipeline_mode = #tpu.pipeline_mode<synchronous>, transform_indices = @transform_2, window_bounds = array<i64: 8, 1>}, {transform_indices = @transform_3, window_bounds = array<i64: 1, 8, 512>}]} {
    %c0 = arith.constant 0 : index
    %c0_0 = arith.constant 0 : index
    %c0_1 = arith.constant 0 : index
    %0 = vector.load %arg2[%c0, %c0_0, %c0_1] : memref<1x8x512xf32, #tpu.memory_space<vmem>>, vector<1x8x512xf32>
    %1 = vector.shape_cast %0 : vector<1x8x512xf32> to vector<8x512xf32>
    %c0_2 = arith.constant 0 : index
    %c0_3 = arith.constant 0 : index
    %2 = vector.load %arg3[%c0_2, %c0_3] : memref<8x1xf32, #tpu.memory_space<vmem>>, vector<8x1xf32>
    %3 = vector.broadcast %2 : vector<8x1xf32> to vector<8x512xf32>
    %4 = arith.mulf %1, %3 : vector<8x512xf32>
    %c0_4 = arith.constant 0 : index
    %c0_5 = arith.constant 0 : index
    %5 = vector.load %arg4[%c0_4, %c0_5] : memref<8x1xf32, #tpu.memory_space<vmem>>, vector<8x1xf32>
    %6 = vector.broadcast %5 : vector<8x1xf32> to vector<8x512xf32>
    %7 = arith.addf %4, %6 : vector<8x512xf32>
    %cst = arith.constant 0.000000e+00 : f32
    %8 = vector.broadcast %cst : f32 to vector<8x512xf32>
    %9 = arith.maximumf %7, %8 : vector<8x512xf32>
    %c0_6 = arith.constant 0 : index
    %c0_7 = arith.constant 0 : index
    %c0_8 = arith.constant 0 : index
    %10 = vector.load %arg5[%c0_6, %c0_7, %c0_8] : memref<1x8x512xf32, #tpu.memory_space<vmem>>, vector<1x8x512xf32>
    %11 = vector.shape_cast %10 : vector<1x8x512xf32> to vector<8x512xf32>
    %12 = vector.shape_cast %9 : vector<8x512xf32> to vector<1x8x512xf32>
    tpu.vector_store %arg5[%c0_6, %c0_7, %c0_8], %12 {strides = array<i32>} : memref<1x8x512xf32, #tpu.memory_space<vmem>>, vector<1x8x512xf32>,
    return
  }
  func.func @transform_0(%arg0: i32, %arg1: i32) -> (i32, i32, i32) {
    %c0_i32 = arith.constant 0 : i32
    %c0_i32_0 = arith.constant 0 : i32
    return %arg0, %c0_i32, %arg1 : i32, i32, i32
  }
  func.func @transform_1(%arg0: i32, %arg1: i32) -> (i32, i32) {
    %c0_i32 = arith.constant 0 : i32
    %c0_i32_0 = arith.constant 0 : i32
    %c0_i32_1 = arith.constant 0 : i32
    return %c0_i32, %c0_i32_0 : i32, i32
  }
  func.func @transform_2(%arg0: i32, %arg1: i32) -> (i32, i32) {
    %c0_i32 = arith.constant 0 : i32
    %c0_i32_0 = arith.constant 0 : i32
    %c0_i32_1 = arith.constant 0 : i32
    return %c0_i32, %c0_i32_0 : i32, i32
  }
  func.func @transform_3(%arg0: i32, %arg1: i32) -> (i32, i32, i32) {
    %c0_i32 = arith.constant 0 : i32
    %c0_i32_0 = arith.constant 0 : i32
    return %arg0, %c0_i32, %arg1 : i32, i32, i32
  }
}

</mosaic_0001>

<bundles_post_ra>
// kernel: conv_block_forward.3
= control target key start
LH: loop header
LB: loop body
LE: loop exit
PB: predicated region body
PF: predicated region fallthrough
CT: control target
= control target key end

     0   :  { %s448_s12 = smov 0   ;;  %s450_s13 = smov 0   ;;  %s505_s0 = inlined_call_operand.vmem [shape: f32[2,8,2048], index: 0, kind: input, shape index: {}]   ;;  %s506_s1 = inlined_call_operand.vmem [shape: f32[8,1], index: 1, kind: input, shape index: {}]   ;;  %s507_s2 = inlined_call_operand.vmem [shape: f32[8,1], index: 2, kind: input, shape index: {}]   ;;  %s508_s3 = inlined_call_operand.vmem [shape: f32[2,8,2048], index: 3, kind: output, shape index: {}]  }
   0x1   :  { %s452_s14 = smov 0   ;;  %s454_s15 = smov 0  }
   0x2   :  { %s456_s16 = smov 0  }
   0x3 LB: > { %s22_s17 = sadd.s32 1, %s417_s14  ;;  %s25_s18 = sadd.s32 1, %s421_s15  ;;  %s425_s16 = sphi %s456_s16, %s13_s16   ;;  %s421_s15 = sphi %s454_s15, %s512_s15   ;;  %s417_s14 = sphi %s452_s14, %s511_s14   ;;  %s413_s13 = sphi %s450_s13, %s510_s13   ;;  %s409_s12 = sphi %s448_s12, %s509_s12  }
   0x4   : > { %p23_p0 = scmp.ge.s32.totalorder %s22_s17, 4  ;;  %p336_p1 = scmp.ge.s32.totalorder %s425_s16, 1 }
   0x5   : > { %p158_p2 = scmp.lt.s32.totalorder %s425_s16, 9 }
   0x6   : > { %s514_s17 = smov (%p23_p0, %s22_s17), 0  ;;  %s516_s18 = smov (!%p23_p0, %s25_s18), %s421_s15 }
   0x7   : > { %p159_p3 = pnand %p336_p1, %p158_p2  ;;  %p27_p4 = scmp.ge.s32.totalorder %s516_s18, 2 }
   0x8   : > { %v214_v0 = vld [vmem:[%s506_s1] sm:$0xff] (!%p159_p3)  ;;  %v427_v1 = vmov (!%p159_p3), 0   ;;  %s337_s23 = sshll.u32 (!%p159_p3), %s409_s12, 2  ;;  %p191_p5 = scmp.lt.s32.totalorder (!%p159_p3), %s413_s13, 1 }
   0x9   : > { %s518_s18 = smov (%p27_p4, %s516_s18), 0  ;;  %162 = sbr.rel (%p159_p3) target bundleno = 149 (0x95), region = 32 }
   0xa   : > { %386 = vset.pattern.permute.xlu0 (!%p159_p3), %v427_v1  ;;  %v224_v2 = vld [vmem:[%s507_s2] sm:$0xff] (!%p159_p3)  ;;  %p193_p6 = scmp.lt.s32.totalorder (!%p159_p3), %s337_s23, 15 }
   0xb   : > { %217 = vperm.xlu0 (!%p159_p3), %386, %v214_v0  }
   0xf   : > { %227 = vperm.xlu0 (!%p159_p3), %386, %v224_v2  }
  0x10   : > { %s520_s13 = smov (!%p191_p5, %s413_s13), 1  ;;  %s522_s23 = smov (!%p193_p6, %s337_s23), 15 }
  0x11   : > { %s338_s24 = sshll.u32 %s520_s13, 4 }
  0x12   : > { %s196_s25 = sadd.s32 %s338_s24, %s522_s23 }
  0x13   : > { %s339_s26 = sshll.u32 %s196_s25, 3 }
  0x14   : > { %s198_s29 = scalar_lea.vmem %s505_s0, %s339_s26  ;;  %s208_s5 = scalar_lea.vmem %s508_s3, %s339_s26 }
  0x15   : > { %v210_v3 = vld [vmem:[%s198_s29] sm:$0xff]  ;;  %v211_v5 = vld [vmem:[%s198_s29 + $0x8] sm:$0xff]  ;;  %v212_v6 = vld [vmem:[%s198_s29 + $0x10] sm:$0xff] }
  0x16   : > { %v213_v7 = vld [vmem:[%s198_s29 + $0x18] sm:$0xff] }
  0x8a   : > { %v218_v4 = vpop.permute.xlu0 %217 }
  0x8b   : > { %v220_v8 = vmul.f32 %v218_v4, %v210_v3  ;;  %v221_v9 = vmul.f32 %v218_v4, %v211_v5  ;;  %v222_v10 = vmul.f32 %v218_v4, %v212_v6  ;;  %v223_v11 = vmul.f32 %v218_v4, %v213_v7 }
  0x8e   : > { %v228_v12 = vpop.permute.xlu0 %227 }
  0x8f   : > { %v230_v13 = vadd.f32 %v228_v12, %v220_v8  ;;  %v231_v14 = vadd.f32 %v228_v12, %v221_v9  ;;  %v232_v15 = vadd.f32 %v228_v12, %v222_v10  ;;  %v233_v16 = vadd.f32 %v228_v12, %v223_v11 }
  0x91   : > { %v234_v17 = vmax.f32 %v230_v13, 0.0  ;;  %v235_v18 = vmax.f32 %v231_v14, 0.0  ;;  %v236_v19 = vmax.f32 %v232_v15, 0.0  ;;  %v237_v20 = vmax.f32 %v233_v16, 0.0 }
  0x93   : > { %238 = vst [vmem:[%s208_s5] sm:$0xff] %v234_v17  ;;  %239 = vst [vmem:[%s208_s5 + $0x8] sm:$0xff] %v235_v18 }
  0x94   : > { %240 = vst [vmem:[%s208_s5 + $0x10] sm:$0xff] %v236_v19  ;;  %241 = vst [vmem:[%s208_s5 + $0x18] sm:$0xff] %v237_v20 }
  0x95 PF: > { %s13_s16 = sadd.s32 1, %s425_s16   ;;  %s509_s12 = smov %s417_s14 }
  0x96   : > { %p10_p7 = scmp.ge.s32.totalorder %s13_s16, 10   ;;  %s510_s13 = smov %s421_s15 }
  0x97   : > { %s511_s14 = smov %s514_s17  ;;  %s512_s15 = smov %s518_s18 }
  0x98   :  { %12 = sbr.rel (!%p10_p7) target bundleno = 3 (0x3), region = 62 }

// kernel: conv_block_forward.2
= control target key start
LH: loop header
LB: loop body
LE: loop exit
PB: predicated region body
PF: predicated region fallthrough
CT: control target
= control target key end

     0   :  { %s5825_s21 = smov 0   ;;  %s5827_s22 = smov 0   ;;  %s6464_s0 = inlined_call_operand.vmem [shape: f32[2,4,2560], index: 0, kind: input, shape index: {}, may-alias: {0,1}]   ;;  %s6465_s1 = inlined_call_operand.vmem [shape: f32[2,4,2560], index: 1, kind: input, shape index: {}, may-alias: {0,1}]   ;;  %s6466_s2 = inlined_call_operand.vmem [shape: f32[27,8,4], index: 2, kind: input, shape index: {}]   ;;  %s6467_s3 = inlined_call_operand.vmem [shape: f32[1,2048], index: 3, kind: input, shape index: {}]   ;;  %s6468_s4 = inlined_call_operand.vmem [shape: f32[2,8,2048], index: 4, kind: output, shape index: {0}]   ;;  %s6469_s5 = inlined_call_operand.vmem [shape: f32[2,4,8,1], index: 5, kind: output, shape index: {1}]   ;;  %s6470_s6 = inlined_call_operand.vmem [shape: f32[2,4,8,1], index: 6, kind: output, shape index: {2}]  }
   0x1   :  { %s5829_s23 = smov 0   ;;  %s5831_s24 = smov 0  }
   0x2   :  { %s5833_s25 = smov 0  }
   0x3 LB: > { %s26_s26 = sadd.s32 1, %s5753_s23  ;;  %s29_s27 = sadd.s32 1, %s5757_s24  ;;  %s5761_s25 = sphi %s5833_s25, %s17_s25   ;;  %s5757_s24 = sphi %s5831_s24, %s6474_s24   ;;  %s5753_s23 = sphi %s5829_s23, %s6473_s23   ;;  %s5749_s22 = sphi %s5827_s22, %s6472_s22   ;;  %s5745_s21 = sphi %s5825_s21, %s6471_s21  }
   0x4   : > { %p27_p0 = scmp.ge.s32.totalorder %s26_s26, 4  ;;  %p5343_p1 = scmp.ge.s32.totalorder %s5761_s25, 1 }
   0x5   : > { %p273_p2 = scmp.lt.s32.totalorder %s5761_s25, 9 }
   0x6   : > { %s6476_s26 = smov (%p27_p0, %s26_s26), 0  ;;  %s6478_s27 = smov (!%p27_p0, %s29_s27), %s5757_s24 }
   0x7   : > { %p274_p3 = pnand %p5343_p1, %p273_p2  ;;  %p31_p4 = scmp.ge.s32.totalorder %s6478_s27, 2 }
   0x8   : > { %s5858_s28 = sshll.u32 (!%p274_p3), %s5745_s21, 2  ;;  %p342_p5 = scmp.lt.s32.totalorder (!%p274_p3), %s5749_s22, 1  ;;  %v5763_v0 = vmov (!%p274_p3), 0.0   ;;  %vm418_vm0 = vcmask (!%p274_p3), 1039360   ;;  %vm427_vm1 = vcmask (!%p274_p3), 1043456   ;;  %v5356_v15 = vld [vmem:[%s6466_s2 + $0x8] sm:$0xff] (!%p274_p3) }
   0x9   : > { %s6480_s27 = smov (%p31_p4, %s6478_s27), 0  ;;  %277 = sbr.rel (%p274_p3) target bundleno = 762 (0x2fa), region = 36 }
   0xa   : > { %p344_p6 = scmp.lt.s32.totalorder (!%p274_p3), %s5858_s28, 19  ;;  %s5547_s7 = sadd.s32 (!%p274_p3), 4, %s5858_s28  ;;  %571 = vmatprep.mubr.f32.mxu1 (!%p274_p3), %v5763_v0  ;;  %500 = vmatprep.mubr.f32.mxu0 (!%p274_p3), %v5763_v0  ;;  %vm423_vm2 = vcmask (!%p274_p3), 31744   ;;  %vm743_vm3 = vcmask (!%p274_p3), 1031168   ;;  %v405_v22 = vld [vmem:[%s6466_s2] sm:$0xff] (!%p274_p3)  ;;  %vm917_vm4 = vcmask (!%p274_p3), 949248  }
   0xb   : > { %p355_p7 = scmp.lt.s32.totalorder (!%p274_p3), %s5547_s7, 19  ;;  %s5764_s13 = smov (!%p274_p3), 127   ;;  %v5369_v31 = vld [vmem:[%s6466_s2 + $0x10] sm:$0xff] (!%p274_p3)  ;;  %vm1091_vm5 = vcmask (!%p274_p3), 941056   ;;  %v5376_v40 = vld [vmem:[%s6466_s2 + $0x18] sm:$0xff] (!%p274_p3)  ;;  %vm1265_vm6 = vcmask (!%p274_p3), 932864  }
   0xc   : > { %s5765_s19 = smov (!%p274_p3), 126   ;;  %s5766_s20 = smov (!%p274_p3), 116   ;;  %v5383_v50 = vld [vmem:[%s6466_s2 + $0x20] sm:$0xff] (!%p274_p3)  ;;  %vm1439_vm7 = vcmask (!%p274_p3), 850944   ;;  %v5390_v59 = vld [vmem:[%s6466_s2 + $0x28] sm:$0xff] (!%p274_p3)  ;;  %vm1613_vm8 = vcmask (!%p274_p3), 842752  }
   0xd   : > { %s5772_s10 = smov (!%p274_p3), 112   ;;  %s5773_s11 = smov (!%p274_p3), 111   ;;  %vm1787_vm9 = vcmask (!%p274_p3), 834560   ;;  %vm1961_vm10 = vcmask (!%p274_p3), 916480   ;;  %vm2135_vm11 = vcmask (!%p274_p3), 908288   ;;  %vm2309_vm12 = vcmask (!%p274_p3), 900096  }
   0xe   : > { %s5777_s17 = smov (!%p274_p3), 98   ;;  %s5781_s16 = smov (!%p274_p3), 96   ;;  %vm2483_vm13 = vcmask (!%p274_p3), 818176   ;;  %vm2657_vm14 = vcmask (!%p274_p3), 809984   ;;  %vm2831_vm15 = vcmask (!%p274_p3), 801792  }
   0xf   : > { %p364_p8 = scmp.lt.s32.totalorder (!%p274_p3), %s5858_s28, 15  ;;  %p380_p9 = scmp.lt.s32.totalorder (!%p274_p3), %s5745_s21, 3 }
  0x10   : > { %s6482_s22 = smov (!%p342_p5, %s5749_s22), 1  ;;  %s6484_s7 = smov (!%p355_p7, %s5547_s7), 19 }
  0x11   : > { %s345_s29 = scalar_select %p344_p6, %s5858_s28, 19 }
  0x12   : > { %s5652_s30 = smul.u32 20, %s6482_s22  ;;  %s6486_s28 = smov (!%p364_p8, %s5858_s28), 15 }
  0x13   : > { %s6488_s21 = smov (!%p380_p9, %s5745_s21), 3 }
  0x14   : > { %s347_s8 = sadd.s32 %s5652_s30, %s345_s29  ;;  %s358_s14 = sadd.s32 %s5652_s30, %s6484_s7 }
  0x15   : > { %s5345_s9 = sshll.u32 %s347_s8, 2  ;;  %s5347_s15 = sshll.u32 %s358_s14, 2 }
  0x16   : > { %s349_s12 = scalar_lea.vmem %s6464_s0, %s5345_s9  ;;  %s5880_s18 = scalar_lea.vmem %s6465_s1, %s5347_s15 }
  0x17   : > { %v5871_v1 = vld [vmem:[%s349_s12 + $0x8] sm:$0xff]  ;;  %v5873_v2 = vld [vmem:[%s349_s12] sm:$0xff]  ;;  %s5767_s29 = smov 115   ;;  %s5768_s30 = smov 114  }
  0x18   : > { %412 = vrot.lane.b32.xlu0 %v5871_v1, %s5764_s13  ;;  %408 = vrot.lane.b32.xlu1 %v5873_v2, %s5764_s13  ;;  %v5883_v3 = vld [vmem:[%s5880_s18] sm:$0xff]  ;;  %v5888_v4 = vcombine.high %v5871_v1, %v5871_v1  ;;  %v5893_v5 = vcombine.high %v5873_v2, %v5873_v2  ;;  %s5769_s7 = smov 104   ;;  %s5770_s8 = smov 103  }
  0x19   : > { %s5771_s9 = smov 102   ;;  %v5937_v6 = vcombine.high %v5883_v3, %v5883_v3  ;;  %s5774_s12 = smov 110  }
  0x1a   : > { %s5776_s14 = smov 99  }
  0x1c   : > { %733 = vrot.lane.b32.xlu1 %v5873_v2, %s5765_s19  ;;  %416 = vrot.lane.b32.xlu0 %v5883_v3, %s5764_s13 }
  0x20   : > { %414 = vrot.lane.b32.xlu1 %v5888_v4, %s5764_s13  ;;  %737 = vrot.lane.b32.xlu0 %v5871_v1, %s5765_s19 }
  0x24   : > { %735 = vrot.lane.b32.xlu1 %v5893_v5, %s5765_s19  ;;  %410 = vrot.lane.b32.xlu0 %v5893_v5, %s5764_s13  ;;  %s5775_s13 = smov 100  }
  0x28   : > { %741 = vrot.lane.b32.xlu1 %v5883_v3, %s5765_s19  ;;  %739 = vrot.lane.b32.xlu0 %v5888_v4, %s5765_s19  ;;  %s5787_s19 = smov 72  }
  0x2c   : > { %911 = vrot.lane.b32.xlu1 %v5871_v1, %s5766_s20  ;;  %909 = vrot.lane.b32.xlu0 %v5893_v5, %s5766_s20 }
  0x30   : > { %913 = vrot.lane.b32.xlu1 %v5888_v4, %s5766_s20  ;;  %907 = vrot.lane.b32.xlu0 %v5873_v2, %s5766_s20 }
  0x34   : > { %1083 = vrot.lane.b32.xlu1 %v5893_v5, %s5767_s29  ;;  %915 = vrot.lane.b32.xlu0 %v5883_v3, %s5766_s20 }
  0x38   : > { %1081 = vrot.lane.b32.xlu1 %v5873_v2, %s5767_s29  ;;  %1085 = vrot.lane.b32.xlu0 %v5871_v1, %s5767_s29 }
  0x3c   : > { %1089 = vrot.lane.b32.xlu1 %v5883_v3, %s5767_s29  ;;  %1087 = vrot.lane.b32.xlu0 %v5888_v4, %s5767_s29 }
  0x40   : > { %1259 = vrot.lane.b32.xlu1 %v5871_v1, %s5768_s30  ;;  %1257 = vrot.lane.b32.xlu0 %v5893_v5, %s5768_s30 }
  0x44   : > { %1261 = vrot.lane.b32.xlu1 %v5888_v4, %s5768_s30  ;;  %1255 = vrot.lane.b32.xlu0 %v5873_v2, %s5768_s30 }
  0x48   : > { %1431 = vrot.lane.b32.xlu1 %v5893_v5, %s5769_s7  ;;  %1263 = vrot.lane.b32.xlu0 %v5883_v3, %s5768_s30  ;;  %s5783_s30 = smov 94  }
  0x4c   : > { %1429 = vrot.lane.b32.xlu1 %v5873_v2, %s5769_s7  ;;  %1433 = vrot.lane.b32.xlu0 %v5871_v1, %s5769_s7 }
  0x50   : > { %1437 = vrot.lane.b32.xlu1 %v5883_v3, %s5769_s7  ;;  %1435 = vrot.lane.b32.xlu0 %v5888_v4, %s5769_s7  ;;  %s5778_s7 = smov 88  }
  0x54   : > { %1607 = vrot.lane.b32.xlu1 %v5871_v1, %s5770_s8  ;;  %1605 = vrot.lane.b32.xlu0 %v5893_v5, %s5770_s8 }
  0x58   : > { %1609 = vrot.lane.b32.xlu1 %v5888_v4, %s5770_s8  ;;  %1603 = vrot.lane.b32.xlu0 %v5873_v2, %s5770_s8 }
  0x5c   : > { %1779 = vrot.lane.b32.xlu1 %v5893_v5, %s5771_s9  ;;  %1611 = vrot.lane.b32.xlu0 %v5883_v3, %s5770_s8  ;;  %s5789_s8 = smov 70  }
  0x60   : > { %1777 = vrot.lane.b32.xlu1 %v5873_v2, %s5771_s9  ;;  %1781 = vrot.lane.b32.xlu0 %v5871_v1, %s5771_s9 }
  0x64   : > { %1785 = vrot.lane.b32.xlu1 %v5883_v3, %s5771_s9  ;;  %1783 = vrot.lane.b32.xlu0 %v5888_v4, %s5771_s9  ;;  %s5784_s9 = smov 84  }
  0x68   : > { %1955 = vrot.lane.b32.xlu1 %v5888_v4, %s5772_s10  ;;  %1953 = vrot.lane.b32.xlu0 %v5871_v1, %s5772_s10 }
  0x6c   : > { %1957 = vrot.lane.b32.xlu1 %v5883_v3, %s5772_s10  ;;  %1951 = vrot.lane.b32.xlu0 %v5893_v5, %s5772_s10 }
  0x70   : > { %2127 = vrot.lane.b32.xlu1 %v5871_v1, %s5773_s11  ;;  %1959 = vrot.lane.b32.xlu0 %v5937_v6, %s5772_s10  ;;  %s5779_s10 = smov 87  }
  0x74   : > { %2125 = vrot.lane.b32.xlu1 %v5893_v5, %s5773_s11  ;;  %2129 = vrot.lane.b32.xlu0 %v5888_v4, %s5773_s11 }
  0x78   : > { %2133 = vrot.lane.b32.xlu1 %v5937_v6, %s5773_s11  ;;  %2131 = vrot.lane.b32.xlu0 %v5883_v3, %s5773_s11 }
  0x7c   : > { %2303 = vrot.lane.b32.xlu1 %v5888_v4, %s5774_s12  ;;  %2301 = vrot.lane.b32.xlu0 %v5871_v1, %s5774_s12 }
  0x80   : > { %2305 = vrot.lane.b32.xlu1 %v5883_v3, %s5774_s12  ;;  %2299 = vrot.lane.b32.xlu0 %v5893_v5, %s5774_s12 }
  0x84   : > { %2475 = vrot.lane.b32.xlu1 %v5871_v1, %s5775_s13  ;;  %2307 = vrot.lane.b32.xlu0 %v5937_v6, %s5774_s12  ;;  %s5785_s12 = smov 83  }
  0x88   : > { %2473 = vrot.lane.b32.xlu1 %v5893_v5, %s5775_s13  ;;  %2477 = vrot.lane.b32.xlu0 %v5888_v4, %s5775_s13 }
  0x8a   : > { %v413_v7 = vpop.permute.xlu0 %412  ;;  %v409_v8 = vpop.permute.xlu1 %408 }
  0x8c   : > { %2481 = vrot.lane.b32.xlu1 %v5937_v6, %s5775_s13  ;;  %2479 = vrot.lane.b32.xlu0 %v5883_v3, %s5775_s13  ;;  %s5780_s13 = smov 86  }
  0x8e   : > { %v734_v9 = vpop.permute.xlu1 %733  ;;  %v417_v10 = vpop.permute.xlu0 %416 }
  0x90   : > { %2651 = vrot.lane.b32.xlu1 %v5888_v4, %s5776_s14  ;;  %2649 = vrot.lane.b32.xlu0 %v5871_v1, %s5776_s14 }
  0x92   : > { %v415_v11 = vpop.permute.xlu1 %414  ;;  %v738_v12 = vpop.permute.xlu0 %737 }
  0x93   : > { %v422_v13 = vsel %vm418_vm0, %v415_v11, %v417_v10  ;;  %v421_v14 = vsel %vm418_vm0, %v413_v7, %v415_v11  ;;  %v5397_v10 = vld [vmem:[%s6466_s2 + $0x30] sm:$0xff] }
  0x94   : > { %5360 = vmatprep.subr.msk.mxu1 %vm427_vm1, %v422_v13  ;;  %2653 = vrot.lane.b32.xlu1 %v5883_v3, %s5776_s14 }
  0x95   : > { %2647 = vrot.lane.b32.xlu0 %v5893_v5, %s5776_s14  ;;  %5361 = vmatpush1.msk.msra.mxu1 %vm427_vm1, %v421_v14 }
  0x96   : > { %5362 = vmatmul.mubr.msk.f32.vlgmr.msra.gmra.mrb[0].mxu1 %vm423_vm2, %v5356_v15  ;;  %v736_v16 = vpop.permute.xlu1 %735  ;;  %5366 = vmatprep.subr.msk.mxu1 %vm427_vm1, %v5888_v4  ;;  %v411_v17 = vpop.permute.xlu0 %410 }
  0x97   : > { %5367 = vmatpush1.msk.msra.mxu1 %vm427_vm1, %v5871_v1  ;;  %724 = vmatprep.mubr.f32.mxu1 %v5763_v0  ;;  %v420_v18 = vsel %vm418_vm0, %v411_v17, %v413_v7  ;;  %v419_v19 = vsel %vm418_vm0, %v409_v8, %v411_v17  ;;  %v745_v23 = vsel %vm743_vm3, %v736_v16, %v738_v12  ;;  %v6080_v8 = vld [vmem:[%s5880_s18 + $0x8] sm:$0xff]  ;;  %s5782_s18 = smov 95   ;;  %vm3005_vm0 = vcmask 719872  }
  0x98   : > { %2823 = vrot.lane.b32.xlu1 %v5871_v1, %s5777_s17  ;;  %5357 = vmatprep.subr.msk.mxu0 %vm427_vm1, %v420_v18  ;;  %v744_v29 = vsel %vm743_vm3, %v734_v9, %v736_v16 }
  0x99   : > { %2655 = vrot.lane.b32.xlu0 %v5937_v6, %s5776_s14  ;;  %5358 = vmatpush1.msk.msra.mxu0 %vm427_vm1, %v419_v19  ;;  %v5404_v19 = vld [vmem:[%s6466_s2 + $0x38] sm:$0xff] }
  0x9a   : > { %v742_v20 = vpop.permute.xlu1 %741  ;;  %5359 = vmatmul.mubr.msk.f32.vlgmr.msra.gmra.mrb[0].mxu0 %vm423_vm2, %v5356_v15  ;;  %5363 = vmatprep.subr.msk.mxu0 %vm427_vm1, %v5893_v5  ;;  %v740_v21 = vpop.permute.xlu0 %739 }
  0x9b   : > { %5364 = vmatpush1.msk.msra.mxu0 %vm427_vm1, %v5873_v2  ;;  %v747_v24 = vsel %vm743_vm3, %v740_v21, %v742_v20  ;;  %v746_v25 = vsel %vm743_vm3, %v738_v12, %v740_v21  ;;  %653 = vmatprep.mubr.f32.mxu0 %v5763_v0  ;;  %vm3179_vm3 = vcmask 711680  }
  0x9c   : > { %2821 = vrot.lane.b32.xlu1 %v5893_v5, %s5777_s17  ;;  %5370 = vmatprep.subr.msk.mxu0 %vm427_vm1, %v745_v23 }
  0x9d   : > { %2825 = vrot.lane.b32.xlu0 %v5888_v4, %s5777_s17  ;;  %5373 = vmatprep.subr.msk.mxu1 %vm427_vm1, %v747_v24 }
  0x9e   : > { %5368 = vmatmul.mubr.msk.f32.vlgmr.msra.gmra.mrb[0].mxu1 %vm423_vm2, %v405_v22  ;;  %v912_v26 = vpop.permute.xlu1 %911  ;;  %v910_v27 = vpop.permute.xlu0 %909 }
  0x9f   : > { %5374 = vmatpush1.msk.msra.mxu1 %vm427_vm1, %v746_v25  ;;  %894 = vmatprep.mubr.f32.mxu1 %v5763_v0  ;;  %v919_v32 = vsel %vm917_vm4, %v910_v27, %v912_v26 }
  0xa0   : > { %2829 = vrot.lane.b32.xlu1 %v5937_v6, %s5777_s17 }
  0xa1   : > { %2827 = vrot.lane.b32.xlu0 %v5883_v3, %s5777_s17  ;;  %s5786_s17 = smov 82  }
  0xa2   : > { %v914_v28 = vpop.permute.xlu1 %913  ;;  %5365 = vmatmul.mubr.msk.f32.vlgmr.msra.gmra.mrb[0].mxu0 %vm423_vm2, %v405_v22  ;;  %v908_v30 = vpop.permute.xlu0 %907 }
  0xa3   : > { %5371 = vmatpush1.msk.msra.mxu0 %vm427_vm1, %v744_v29  ;;  %823 = vmatprep.mubr.f32.mxu0 %v5763_v0  ;;  %v920_v36 = vsel %vm917_vm4, %v912_v26, %v914_v28  ;;  %v918_v38 = vsel %vm917_vm4, %v908_v30, %v910_v27  ;;  %v5411_v29 = vld [vmem:[%s6466_s2 + $0x40] sm:$0xff] }
  0xa4   : > { %2999 = vrot.lane.b32.xlu1 %v5888_v4, %s5778_s7  ;;  %5377 = vmatprep.subr.msk.mxu0 %vm427_vm1, %v919_v32 }
  0xa5   : > { %2997 = vrot.lane.b32.xlu0 %v5871_v1, %s5778_s7 }
  0xa6   : > { %v1084_v33 = vpop.permute.xlu1 %1083  ;;  %5375 = vmatmul.mubr.msk.f32.vlgmr.msra.gmra.mrb[0].mxu1 %vm423_vm2, %v5369_v31  ;;  %v916_v34 = vpop.permute.xlu0 %915 }
  0xa7   : > { %1068 = vmatprep.mubr.f32.mxu1 %v5763_v0  ;;  %v921_v35 = vsel %vm917_vm4, %v914_v28, %v916_v34  ;;  %vm3353_vm4 = vcmask 703488  }
  0xa8   : > { %3001 = vrot.lane.b32.xlu1 %v5883_v3, %s5778_s7  ;;  %5380 = vmatprep.subr.msk.mxu1 %vm427_vm1, %v921_v35 }
  0xa9   : > { %2995 = vrot.lane.b32.xlu0 %v5893_v5, %s5778_s7  ;;  %5381 = vmatpush1.msk.msra.mxu1 %vm427_vm1, %v920_v36  ;;  %v5418_v36 = vld [vmem:[%s6466_s2 + $0x48] sm:$0xff] }
  0xaa   : > { %v1082_v37 = vpop.permute.xlu1 %1081  ;;  %5372 = vmatmul.mubr.msk.f32.vlgmr.msra.gmra.mrb[0].mxu0 %vm423_vm2, %v5369_v31  ;;  %v1086_v39 = vpop.permute.xlu0 %1085 }
  0xab   : > { %5378 = vmatpush1.msk.msra.mxu0 %vm427_vm1, %v918_v38  ;;  %v1093_v41 = vsel %vm1091_vm5, %v1084_v33, %v1086_v39  ;;  %997 = vmatprep.mubr.f32.mxu0 %v5763_v0  ;;  %v1092_v47 = vsel %vm1091_vm5, %v1082_v37, %v1084_v33 }
  0xac   : > { %3171 = vrot.lane.b32.xlu1 %v5871_v1, %s5779_s10  ;;  %5384 = vmatprep.subr.msk.mxu0 %vm427_vm1, %v1093_v41 }
  0xad   : > { %3003 = vrot.lane.b32.xlu0 %v5937_v6, %s5778_s7  ;;  %s5788_s7 = smov 71  }
  0xae   : > { %v1090_v42 = vpop.permute.xlu1 %1089  ;;  %5382 = vmatmul.mubr.msk.f32.vlgmr.msra.gmra.mrb[0].mxu1 %vm423_vm2, %v5376_v40  ;;  %v1088_v43 = vpop.permute.xlu0 %1087 }
  0xaf   : > { %1242 = vmatprep.mubr.f32.mxu1 %v5763_v0  ;;  %v1094_v44 = vsel %vm1091_vm5, %v1086_v39, %v1088_v43  ;;  %v1095_v45 = vsel %vm1091_vm5, %v1088_v43, %v1090_v42  ;;  %vm3527_vm5 = vcmask 785408  }
  0xb0   : > { %3169 = vrot.lane.b32.xlu1 %v5893_v5, %s5779_s10  ;;  %5387 = vmatprep.subr.msk.mxu1 %vm427_vm1, %v1095_v45  ;;  %v5425_v45 = vld [vmem:[%s6466_s2 + $0x50] sm:$0xff] }
  0xb1   : > { %3173 = vrot.lane.b32.xlu0 %v5888_v4, %s5779_s10  ;;  %5388 = vmatpush1.msk.msra.mxu1 %vm427_vm1, %v1094_v44 }
  0xb2   : > { %v1260_v46 = vpop.permute.xlu1 %1259  ;;  %5379 = vmatmul.mubr.msk.f32.vlgmr.msra.gmra.mrb[0].mxu0 %vm423_vm2, %v5376_v40  ;;  %v1258_v48 = vpop.permute.xlu0 %1257 }
  0xb3   : > { %5385 = vmatpush1.msk.msra.mxu0 %vm427_vm1, %v1092_v47  ;;  %v1267_v49 = vsel %vm1265_vm6, %v1258_v48, %v1260_v46  ;;  %1171 = vmatprep.mubr.f32.mxu0 %v5763_v0 }
  0xb4   : > { %3177 = vrot.lane.b32.xlu1 %v5937_v6, %s5779_s10  ;;  %5391 = vmatprep.subr.msk.mxu0 %vm427_vm1, %v1267_v49 }
  0xb5   : > { %3175 = vrot.lane.b32.xlu0 %v5883_v3, %s5779_s10 }
  0xb6   : > { %v1262_v51 = vpop.permute.xlu1 %1261  ;;  %5389 = vmatmul.mubr.msk.f32.vlgmr.msra.gmra.mrb[0].mxu1 %vm423_vm2, %v5383_v50  ;;  %v1256_v52 = vpop.permute.xlu0 %1255 }
  0xb7   : > { %1416 = vmatprep.mubr.f32.mxu1 %v5763_v0  ;;  %v1266_v54 = vsel %vm1265_vm6, %v1256_v52, %v1258_v48  ;;  %v1268_v57 = vsel %vm1265_vm6, %v1260_v46, %v1262_v51 }
  0xb8   : > { %3347 = vrot.lane.b32.xlu1 %v5888_v4, %s5780_s13 }
  0xb9   : > { %3345 = vrot.lane.b32.xlu0 %v5871_v1, %s5780_s13 }
  0xba   : > { %v1432_v53 = vpop.permute.xlu1 %1431  ;;  %5386 = vmatmul.mubr.msk.f32.vlgmr.msra.gmra.mrb[0].mxu0 %vm423_vm2, %v5383_v50  ;;  %v1264_v55 = vpop.permute.xlu0 %1263 }
  0xbb   : > { %5392 = vmatpush1.msk.msra.mxu0 %vm427_vm1, %v1266_v54  ;;  %v1269_v56 = vsel %vm1265_vm6, %v1262_v51, %v1264_v55  ;;  %1345 = vmatprep.mubr.f32.mxu0 %v5763_v0  ;;  %v5432_v55 = vld [vmem:[%s6466_s2 + $0x58] sm:$0xff]  ;;  %vm3701_vm6 = vcmask 777216  }
  0xbc   : > { %3349 = vrot.lane.b32.xlu1 %v5883_v3, %s5780_s13  ;;  %5394 = vmatprep.subr.msk.mxu1 %vm427_vm1, %v1269_v56 }
  0xbd   : > { %3343 = vrot.lane.b32.xlu0 %v5893_v5, %s5780_s13  ;;  %5395 = vmatpush1.msk.msra.mxu1 %vm427_vm1, %v1268_v57 }
  0xbe   : > { %v1430_v58 = vpop.permute.xlu1 %1429  ;;  %v1434_v60 = vpop.permute.xlu0 %1433  ;;  %5396 = vmatmul.mubr.msk.f32.vlgmr.msra.gmra.mrb[0].mxu1 %vm423_vm2, %v5390_v59 }
  0xbf   : > { %v1441_v61 = vsel %vm1439_vm7, %v1432_v53, %v1434_v60  ;;  %1590 = vmatprep.mubr.f32.mxu1 %v5763_v0  ;;  %v1440_v63 = vsel %vm1439_vm7, %v1430_v58, %v1432_v53 }
  0xc0   : > { %3519 = vrot.lane.b32.xlu1 %v5888_v4, %s5781_s16  ;;  %5398 = vmatprep.subr.msk.mxu0 %vm427_vm1, %v1441_v61 }
  0xc1   : > { %3351 = vrot.lane.b32.xlu0 %v5937_v6, %s5780_s13 }
  0xc2   : > { %v1438_v62 = vpop.permute.xlu1 %1437  ;;  %5393 = vmatmul.mubr.msk.f32.vlgmr.msra.gmra.mrb[0].mxu0 %vm423_vm2, %v5390_v59  ;;  %v1436_v2 = vpop.permute.xlu0 %1435 }
  0xc3   : > { %5399 = vmatpush1.msk.msra.mxu0 %vm427_vm1, %v1440_v63  ;;  %v1442_v5 = vsel %vm1439_vm7, %v1434_v60, %v1436_v2  ;;  %v1443_v7 = vsel %vm1439_vm7, %v1436_v2, %v1438_v62  ;;  %1519 = vmatprep.mubr.f32.mxu0 %v5763_v0  ;;  %vm3875_vm7 = vcmask 769024  }
  0xc4   : > { %3517 = vrot.lane.b32.xlu1 %v5871_v1, %s5781_s16  ;;  %5401 = vmatprep.subr.msk.mxu1 %vm427_vm1, %v1443_v7 }
  0xc5   : > { %3521 = vrot.lane.b32.xlu0 %v5883_v3, %s5781_s16  ;;  %5402 = vmatpush1.msk.msra.mxu1 %vm427_vm1, %v1442_v5  ;;  %v5439_v5 = vld [vmem:[%s6466_s2 + $0x60] sm:$0xff] }
  0xc6   : > { %v1608_v9 = vpop.permute.xlu1 %1607  ;;  %v1606_v11 = vpop.permute.xlu0 %1605  ;;  %5403 = vmatmul.mubr.msk.f32.vlgmr.msra.gmra.mrb[0].mxu1 %vm423_vm2, %v5397_v10 }
  0xc7   : > { %v1615_v12 = vsel %vm1613_vm8, %v1606_v11, %v1608_v9  ;;  %1764 = vmatprep.mubr.f32.mxu1 %v5763_v0 }
  0xc8   : > { %3525 = vrot.lane.b32.xlu1 %v6080_v8, %s5781_s16  ;;  %5405 = vmatprep.subr.msk.mxu0 %vm427_vm1, %v1615_v12 }
  0xc9   : > { %3523 = vrot.lane.b32.xlu0 %v5937_v6, %s5781_s16 }
  0xca   : > { %v1610_v13 = vpop.permute.xlu1 %1609  ;;  %v1604_v14 = vpop.permute.xlu0 %1603  ;;  %5400 = vmatmul.mubr.msk.f32.vlgmr.msra.gmra.mrb[0].mxu0 %vm423_vm2, %v5397_v10 }
  0xcb   : > { %v1614_v15 = vsel %vm1613_vm8, %v1604_v14, %v1606_v11  ;;  %1693 = vmatprep.mubr.f32.mxu0 %v5763_v0  ;;  %v1616_v20 = vsel %vm1613_vm8, %v1608_v9, %v1610_v13 }
  0xcc   : > { %3695 = vrot.lane.b32.xlu1 %v5883_v3, %s5782_s18  ;;  %5406 = vmatpush1.msk.msra.mxu0 %vm427_vm1, %v1614_v15 }
  0xcd   : > { %3693 = vrot.lane.b32.xlu0 %v5888_v4, %s5782_s18 }
  0xce   : > { %v1780_v16 = vpop.permute.xlu1 %1779  ;;  %v1612_v17 = vpop.permute.xlu0 %1611 }
  0xcf   : > { %v1617_v18 = vsel %vm1613_vm8, %v1610_v13, %v1612_v17  ;;  %v5446_v17 = vld [vmem:[%s6466_s2 + $0x68] sm:$0xff]  ;;  %vm4049_vm8 = vcmask 687104  }
  0xd0   : > { %3697 = vrot.lane.b32.xlu1 %v5937_v6, %s5782_s18  ;;  %5408 = vmatprep.subr.msk.mxu1 %vm427_vm1, %v1617_v18 }
  0xd1   : > { %3691 = vrot.lane.b32.xlu0 %v5871_v1, %s5782_s18  ;;  %5409 = vmatpush1.msk.msra.mxu1 %vm427_vm1, %v1616_v20 }
  0xd2   : > { %v1778_v21 = vpop.permute.xlu1 %1777  ;;  %v1782_v23 = vpop.permute.xlu0 %1781  ;;  %5407 = vmatmul.mubr.msk.f32.vlgmr.msra.gmra.mrb[0].mxu0 %vm423_vm2, %v5404_v19  ;;  %5410 = vmatmul.mubr.msk.f32.vlgmr.msra.gmra.mrb[0].mxu1 %vm423_vm2, %v5404_v19 }
  0xd3   : > { %v1788_v22 = vsel %vm1787_vm9, %v1778_v21, %v1780_v16  ;;  %v1789_v24 = vsel %vm1787_vm9, %v1780_v16, %v1782_v23  ;;  %1867 = vmatprep.mubr.f32.mxu0 %v5763_v0  ;;  %1938 = vmatprep.mubr.f32.mxu1 %v5763_v0 }
  0xd4   : > { %3867 = vrot.lane.b32.xlu1 %v5888_v4, %s5783_s30  ;;  %5412 = vmatprep.subr.msk.mxu0 %vm427_vm1, %v1789_v24 }
  0xd5   : > { %3699 = vrot.lane.b32.xlu0 %v6080_v8, %s5782_s18  ;;  %5413 = vmatpush1.msk.msra.mxu0 %vm427_vm1, %v1788_v22  ;;  %s5350_s18 = sshll.u32 %s6482_s22, 4 }
  0xd6   : > { %v1786_v25 = vpop.permute.xlu1 %1785  ;;  %v1784_v26 = vpop.permute.xlu0 %1783 }
  0xd7   : > { %v1790_v27 = vsel %vm1787_vm9, %v1782_v23, %v1784_v26  ;;  %v1791_v28 = vsel %vm1787_vm9, %v1784_v26, %v1786_v25  ;;  %vm4223_vm9 = vcmask 678912  }
  0xd8   : > { %3865 = vrot.lane.b32.xlu1 %v5871_v1, %s5783_s30  ;;  %5415 = vmatprep.subr.msk.mxu1 %vm427_vm1, %v1791_v28 }
  0xd9   : > { %3869 = vrot.lane.b32.xlu0 %v5883_v3, %s5783_s30  ;;  %5416 = vmatpush1.msk.msra.mxu1 %vm427_vm1, %v1790_v27  ;;  %v5453_v27 = vld [vmem:[%s6466_s2 + $0x70] sm:$0xff] }
  0xda   : > { %v1956_v30 = vpop.permute.xlu1 %1955  ;;  %v1954_v31 = vpop.permute.xlu0 %1953  ;;  %5414 = vmatmul.mubr.msk.f32.vlgmr.msra.gmra.mrb[0].mxu0 %vm423_vm2, %v5411_v29  ;;  %5417 = vmatmul.mubr.msk.f32.vlgmr.msra.gmra.mrb[0].mxu1 %vm423_vm2, %v5411_v29 }
  0xdb   : > { %v1963_v32 = vsel %vm1961_vm10, %v1954_v31, %v1956_v30  ;;  %2041 = vmatprep.mubr.f32.mxu0 %v5763_v0  ;;  %2112 = vmatprep.mubr.f32.mxu1 %v5763_v0 }
  0xdc   : > { %3873 = vrot.lane.b32.xlu1 %v6080_v8, %s5783_s30  ;;  %5419 = vmatprep.subr.msk.mxu0 %vm427_vm1, %v1963_v32 }
  0xdd   : > { %3871 = vrot.lane.b32.xlu0 %v5937_v6, %s5783_s30  ;;  %s366_s30 = scalar_lea.vmem %s6467_s3, %s6486_s28 }
  0xde   : > { %v1958_v33 = vpop.permute.xlu1 %1957  ;;  %v1952_v34 = vpop.permute.xlu0 %1951 }
  0xdf   : > { %v1962_v35 = vsel %vm1961_vm10, %v1952_v34, %v1954_v31  ;;  %v1964_v40 = vsel %vm1961_vm10, %v1956_v30, %v1958_v33  ;;  %v5460_v34 = vld [vmem:[%s6466_s2 + $0x78] sm:$0xff] }
  0xe0   : > { %4043 = vrot.lane.b32.xlu1 %v5883_v3, %s5784_s9  ;;  %5420 = vmatpush1.msk.msra.mxu0 %vm427_vm1, %v1962_v35 }
  0xe1   : > { %4041 = vrot.lane.b32.xlu0 %v5888_v4, %s5784_s9 }
  0xe2   : > { %v2128_v37 = vpop.permute.xlu1 %2127  ;;  %v1960_v38 = vpop.permute.xlu0 %1959  ;;  %5421 = vmatmul.mubr.msk.f32.vlgmr.msra.gmra.mrb[0].mxu0 %vm423_vm2, %v5418_v36 }
  0xe3   : > { %v1965_v39 = vsel %vm1961_vm10, %v1958_v33, %v1960_v38  ;;  %2215 = vmatprep.mubr.f32.mxu0 %v5763_v0  ;;  %vm4397_vm10 = vcmask 670720  }
  0xe4   : > { %4045 = vrot.lane.b32.xlu1 %v5937_v6, %s5784_s9  ;;  %5422 = vmatprep.subr.msk.mxu1 %vm427_vm1, %v1965_v39 }
  0xe5   : > { %4039 = vrot.lane.b32.xlu0 %v5871_v1, %s5784_s9  ;;  %5423 = vmatpush1.msk.msra.mxu1 %vm427_vm1, %v1964_v40 }
  0xe6   : > { %v2126_v41 = vpop.permute.xlu1 %2125  ;;  %v2130_v43 = vpop.permute.xlu0 %2129  ;;  %5424 = vmatmul.mubr.msk.f32.vlgmr.msra.gmra.mrb[0].mxu1 %vm423_vm2, %v5418_v36 }
  0xe7   : > { %v2136_v42 = vsel %vm2135_vm11, %v2126_v41, %v2128_v37  ;;  %v2137_v44 = vsel %vm2135_vm11, %v2128_v37, %v2130_v43  ;;  %2286 = vmatprep.mubr.f32.mxu1 %v5763_v0 }
  0xe8   : > { %4215 = vrot.lane.b32.xlu1 %v5888_v4, %s5785_s12  ;;  %5426 = vmatprep.subr.msk.mxu0 %vm427_vm1, %v2137_v44 }
  0xe9   : > { %4047 = vrot.lane.b32.xlu0 %v6080_v8, %s5784_s9  ;;  %5427 = vmatpush1.msk.msra.mxu0 %vm427_vm1, %v2136_v42  ;;  %v5467_v42 = vld [vmem:[%s6466_s2 + $0x80] sm:$0xff] }
  0xea   : > { %v2134_v46 = vpop.permute.xlu1 %2133  ;;  %v2132_v47 = vpop.permute.xlu0 %2131  ;;  %5428 = vmatmul.mubr.msk.f32.vlgmr.msra.gmra.mrb[0].mxu0 %vm423_vm2, %v5425_v45 }
  0xeb   : > { %v2138_v48 = vsel %vm2135_vm11, %v2130_v43, %v2132_v47  ;;  %v2139_v49 = vsel %vm2135_vm11, %v2132_v47, %v2134_v46  ;;  %2389 = vmatprep.mubr.f32.mxu0 %v5763_v0  ;;  %vm4571_vm11 = vcmask 588800  }
  0xec   : > { %4213 = vrot.lane.b32.xlu1 %v5871_v1, %s5785_s12  ;;  %5429 = vmatprep.subr.msk.mxu1 %vm427_vm1, %v2139_v49 }
  0xed   : > { %4217 = vrot.lane.b32.xlu0 %v5883_v3, %s5785_s12  ;;  %5430 = vmatpush1.msk.msra.mxu1 %vm427_vm1, %v2138_v48 }
  0xee   : > { %v2304_v50 = vpop.permute.xlu1 %2303  ;;  %v2302_v51 = vpop.permute.xlu0 %2301  ;;  %5431 = vmatmul.mubr.msk.f32.vlgmr.msra.gmra.mrb[0].mxu1 %vm423_vm2, %v5425_v45 }
  0xef   : > { %v2311_v52 = vsel %vm2309_vm12, %v2302_v51, %v2304_v50  ;;  %2460 = vmatprep.mubr.f32.mxu1 %v5763_v0 }
  0xf0   : > { %4221 = vrot.lane.b32.xlu1 %v6080_v8, %s5785_s12  ;;  %5433 = vmatprep.subr.msk.mxu0 %vm427_vm1, %v2311_v52  ;;  %v5474_v52 = vld [vmem:[%s6466_s2 + $0x88] sm:$0xff] }
  0xf1   : > { %4219 = vrot.lane.b32.xlu0 %v5937_v6, %s5785_s12 }
  0xf2   : > { %v2306_v53 = vpop.permute.xlu1 %2305  ;;  %v2300_v54 = vpop.permute.xlu0 %2299 }
  0xf3   : > { %v2310_v56 = vsel %vm2309_vm12, %v2300_v54, %v2302_v51  ;;  %v2312_v60 = vsel %vm2309_vm12, %v2304_v50, %v2306_v53 }
  0xf4   : > { %4391 = vrot.lane.b32.xlu1 %v5883_v3, %s5786_s17  ;;  %5434 = vmatpush1.msk.msra.mxu0 %vm427_vm1, %v2310_v56 }
  0xf5   : > { %4389 = vrot.lane.b32.xlu0 %v5888_v4, %s5786_s17  ;;  %5435 = vmatmul.mubr.msk.f32.vlgmr.msra.gmra.mrb[0].mxu0 %vm423_vm2, %v5432_v55 }
  0xf6   : > { %v2476_v57 = vpop.permute.xlu1 %2475  ;;  %v2308_v58 = vpop.permute.xlu0 %2307  ;;  %2563 = vmatprep.mubr.f32.mxu0 %v5763_v0 }
  0xf7   : > { %v2313_v59 = vsel %vm2309_vm12, %v2306_v53, %v2308_v58  ;;  %vm4745_vm12 = vcmask 580608  }
  0xf8   : > { %4393 = vrot.lane.b32.xlu1 %v5937_v6, %s5786_s17  ;;  %5436 = vmatprep.subr.msk.mxu1 %vm427_vm1, %v2313_v59 }
  0xf9   : > { %4387 = vrot.lane.b32.xlu0 %v5871_v1, %s5786_s17  ;;  %5437 = vmatpush1.msk.msra.mxu1 %vm427_vm1, %v2312_v60 }
  0xfa   : > { %v2474_v61 = vpop.permute.xlu1 %2473  ;;  %v2478_v63 = vpop.permute.xlu0 %2477  ;;  %5438 = vmatmul.mubr.msk.f32.vlgmr.msra.gmra.mrb[0].mxu1 %vm423_vm2, %v5432_v55 }
  0xfb   : > { %v2484_v62 = vsel %vm2483_vm13, %v2474_v61, %v2476_v57  ;;  %v2485_v2 = vsel %vm2483_vm13, %v2476_v57, %v2478_v63  ;;  %2634 = vmatprep.mubr.f32.mxu1 %v5763_v0 }
  0xfc   : > { %4563 = vrot.lane.b32.xlu1 %v5888_v4, %s5787_s19  ;;  %5440 = vmatprep.subr.msk.mxu0 %vm427_vm1, %v2485_v2 }
  0xfd   : > { %4395 = vrot.lane.b32.xlu0 %v6080_v8, %s5786_s17  ;;  %5441 = vmatpush1.msk.msra.mxu0 %vm427_vm1, %v2484_v62  ;;  %v5481_v62 = vld [vmem:[%s6466_s2 + $0x90] sm:$0xff] }
  0xfe   : > { %v2482_v7 = vpop.permute.xlu1 %2481  ;;  %v2480_v9 = vpop.permute.xlu0 %2479  ;;  %5442 = vmatmul.mubr.msk.f32.vlgmr.msra.gmra.mrb[0].mxu0 %vm423_vm2, %v5439_v5 }
  0xff   : > { %v2486_v10 = vsel %vm2483_vm13, %v2478_v63, %v2480_v9  ;;  %v2487_v11 = vsel %vm2483_vm13, %v2480_v9, %v2482_v7  ;;  %2737 = vmatprep.mubr.f32.mxu0 %v5763_v0  ;;  %vm4919_vm13 = vcmask 572416  }
 0x100   : > { %4561 = vrot.lane.b32.xlu1 %v5871_v1, %s5787_s19  ;;  %5443 = vmatprep.subr.msk.mxu1 %vm427_vm1, %v2487_v11 }
 0x101   : > { %4565 = vrot.lane.b32.xlu0 %v5883_v3, %s5787_s19  ;;  %5444 = vmatpush1.msk.msra.mxu1 %vm427_vm1, %v2486_v10 }
 0x102   : > { %v2652_v12 = vpop.permute.xlu1 %2651  ;;  %v2650_v13 = vpop.permute.xlu0 %2649  ;;  %5445 = vmatmul.mubr.msk.f32.vlgmr.msra.gmra.mrb[0].mxu1 %vm423_vm2, %v5439_v5 }
 0x103   : > { %v2659_v14 = vsel %vm2657_vm14, %v2650_v13, %v2652_v12  ;;  %2808 = vmatprep.mubr.f32.mxu1 %v5763_v0 }
 0x104   : > { %4569 = vrot.lane.b32.xlu1 %v6080_v8, %s5787_s19  ;;  %5447 = vmatprep.subr.msk.mxu0 %vm427_vm1, %v2659_v14  ;;  %v5488_v14 = vld [vmem:[%s6466_s2 + $0x98] sm:$0xff] }
 0x105   : > { %4567 = vrot.lane.b32.xlu0 %v5937_v6, %s5787_s19 }
 0x106   : > { %v2654_v15 = vpop.permute.xlu1 %2653 }
 0x107   : > { %v2648_v16 = vpop.permute.xlu0 %2647  ;;  %v2660_v22 = vsel %vm2657_vm14, %v2652_v12, %v2654_v15 }
 0x108   : > { %v2658_v18 = vsel %vm2657_vm14, %v2648_v16, %v2650_v13  ;;  %4739 = vrot.lane.b32.xlu1 %v5883_v3, %s5788_s7 }
 0x109   : > { %4737 = vrot.lane.b32.xlu0 %v5888_v4, %s5788_s7  ;;  %5448 = vmatpush1.msk.msra.mxu0 %vm427_vm1, %v2658_v18 }
 0x10a   : > { %v2824_v19 = vpop.permute.xlu1 %2823  ;;  %5449 = vmatmul.mubr.msk.f32.vlgmr.msra.gmra.mrb[0].mxu0 %vm423_vm2, %v5446_v17 }
 0x10b   : > { %v2656_v20 = vpop.permute.xlu0 %2655  ;;  %2911 = vmatprep.mubr.f32.mxu0 %v5763_v0 }
 0x10c   : > { %v2661_v21 = vsel %vm2657_vm14, %v2654_v15, %v2656_v20  ;;  %4741 = vrot.lane.b32.xlu1 %v5937_v6, %s5788_s7 }
 0x10d   : > { %4735 = vrot.lane.b32.xlu0 %v5871_v1, %s5788_s7  ;;  %5450 = vmatprep.subr.msk.mxu1 %vm427_vm1, %v2661_v21 }
 0x10e   : > { %5451 = vmatpush1.msk.msra.mxu1 %vm427_vm1, %v2660_v22  ;;  %v2822_v23 = vpop.permute.xlu1 %2821 }
 0x10f   : > { %v2832_v24 = vsel %vm2831_vm15, %v2822_v23, %v2824_v19  ;;  %v2826_v25 = vpop.permute.xlu0 %2825  ;;  %5452 = vmatmul.mubr.msk.f32.vlgmr.msra.gmra.mrb[0].mxu1 %vm423_vm2, %v5446_v17 }
 0x110   : > { %v2833_v26 = vsel %vm2831_vm15, %v2824_v19, %v2826_v25  ;;  %4911 = vrot.lane.b32.xlu1 %v5888_v4, %s5789_s8  ;;  %2982 = vmatprep.mubr.f32.mxu1 %v5763_v0 }
 0x111   : > { %4743 = vrot.lane.b32.xlu0 %v6080_v8, %s5788_s7  ;;  %5454 = vmatprep.subr.msk.mxu0 %vm427_vm1, %v2833_v26  ;;  %s374_s7 = sadd.s32 %s5350_s18, %s6486_s28  ;;  %s5352_s28 = sshll.u32 %s6482_s22, 2 }
 0x112   : > { %5455 = vmatpush1.msk.msra.mxu0 %vm427_vm1, %v2832_v24  ;;  %v2830_v28 = vpop.permute.xlu1 %2829  ;;  %v5495_v24 = vld [vmem:[%s6466_s2 + $0xa0] sm:$0xff]  ;;  %s383_s12 = sadd.s32 %s5352_s28, %s6488_s21 }
 0x113   : > { %v2828_v29 = vpop.permute.xlu0 %2827  ;;  %5456 = vmatmul.mubr.msk.f32.vlgmr.msra.gmra.mrb[0].mxu0 %vm423_vm2, %v5453_v27  ;;  %s5353_s13 = sshll.u32 %s383_s12, 3 }
 0x114   : > { %v2834_v30 = vsel %vm2831_vm15, %v2826_v25, %v2828_v29  ;;  %v2835_v4 = vsel %vm2831_vm15, %v2828_v29, %v2830_v28  ;;  %4909 = vrot.lane.b32.xlu1 %v5871_v1, %s5789_s8  ;;  %3085 = vmatprep.mubr.f32.mxu0 %v5763_v0  ;;  %s385_s16 = scalar_lea.vmem %s6469_s5, %s5353_s13  ;;  %s393_s18 = scalar_lea.vmem %s6470_s6, %s5353_s13 }
 0x115   : > { %4913 = vrot.lane.b32.xlu0 %v5883_v3, %s5789_s8  ;;  %5457 = vmatprep.subr.msk.mxu1 %vm427_vm1, %v2835_v4 }
 0x116   : > { %5458 = vmatpush1.msk.msra.mxu1 %vm427_vm1, %v2834_v30  ;;  %v3000_v31 = vpop.permute.xlu1 %2999 }
 0x117   : > { %v2998_v32 = vpop.permute.xlu0 %2997  ;;  %5459 = vmatmul.mubr.msk.f32.vlgmr.msra.gmra.mrb[0].mxu1 %vm423_vm2, %v5453_v27 }
 0x118   : > { %v3007_v33 = vsel %vm3005_vm0, %v2998_v32, %v3000_v31  ;;  %4917 = vrot.lane.b32.xlu1 %v6080_v8, %s5789_s8  ;;  %3156 = vmatprep.mubr.f32.mxu1 %v5763_v0 }
 0x119   : > { %4915 = vrot.lane.b32.xlu0 %v5937_v6, %s5789_s8  ;;  %5461 = vmatprep.subr.msk.mxu0 %vm427_vm1, %v3007_v33  ;;  %v5502_v33 = vld [vmem:[%s6466_s2 + $0xa8] sm:$0xff]  ;;  %s5351_s8 = sshll.u32 %s374_s7, 3 }
 0x11a   : > { %v3002_v1 = vpop.permute.xlu1 %3001  ;;  %s376_s11 = scalar_lea.vmem %s6468_s4, %s5351_s8 }
 0x11b   : > { %v2996_v3 = vpop.permute.xlu0 %2995  ;;  %v3008_v37 = vsel %vm3005_vm0, %v3000_v31, %v3002_v1 }
 0x11c   : > { %v3006_v35 = vsel %vm3005_vm0, %v2996_v3, %v2998_v32 }
 0x11d   : > { %5462 = vmatpush1.msk.msra.mxu0 %vm427_vm1, %v3006_v35 }
 0x11e   : > { %v3172_v36 = vpop.permute.xlu1 %3171  ;;  %5463 = vmatmul.mubr.msk.f32.vlgmr.msra.gmra.mrb[0].mxu0 %vm423_vm2, %v5460_v34 }
 0x11f   : > { %v3004_v8 = vpop.permute.xlu0 %3003  ;;  %3259 = vmatprep.mubr.f32.mxu0 %v5763_v0 }
 0x120   : > { %v3009_v6 = vsel %vm3005_vm0, %v3002_v1, %v3004_v8 }
 0x121   : > { %5464 = vmatprep.subr.msk.mxu1 %vm427_vm1, %v3009_v6 }
 0x122   : > { %5465 = vmatpush1.msk.msra.mxu1 %vm427_vm1, %v3008_v37  ;;  %v3170_v38 = vpop.permute.xlu1 %3169 }
 0x123   : > { %v3180_v39 = vsel %vm3179_vm3, %v3170_v38, %v3172_v36  ;;  %v3174_v40 = vpop.permute.xlu0 %3173  ;;  %5466 = vmatmul.mubr.msk.f32.vlgmr.msra.gmra.mrb[0].mxu1 %vm423_vm2, %v5460_v34 }
 0x124   : > { %v3181_v41 = vsel %vm3179_vm3, %v3172_v36, %v3174_v40  ;;  %3330 = vmatprep.mubr.f32.mxu1 %v5763_v0 }
 0x125   : > { %5468 = vmatprep.subr.msk.mxu0 %vm427_vm1, %v3181_v41 }
 0x126   : > { %5469 = vmatpush1.msk.msra.mxu0 %vm427_vm1, %v3180_v39  ;;  %v3178_v43 = vpop.permute.xlu1 %3177  ;;  %v5509_v39 = vld [vmem:[%s6466_s2 + $0xb0] sm:$0xff] }
 0x127   : > { %v3176_v44 = vpop.permute.xlu0 %3175  ;;  %5470 = vmatmul.mubr.msk.f32.vlgmr.msra.gmra.mrb[0].mxu0 %vm423_vm2, %v5467_v42 }
 0x128   : > { %v3182_v45 = vsel %vm3179_vm3, %v3174_v40, %v3176_v44  ;;  %v3183_v46 = vsel %vm3179_vm3, %v3176_v44, %v3178_v43  ;;  %3433 = vmatprep.mubr.f32.mxu0 %v5763_v0 }
 0x129   : > { %5471 = vmatprep.subr.msk.mxu1 %vm427_vm1, %v3183_v46 }
 0x12a   : > { %5472 = vmatpush1.msk.msra.mxu1 %vm427_vm1, %v3182_v45  ;;  %v3348_v47 = vpop.permute.xlu1 %3347 }
 0x12b   : > { %v3346_v48 = vpop.permute.xlu0 %3345  ;;  %5473 = vmatmul.mubr.msk.f32.vlgmr.msra.gmra.mrb[0].mxu1 %vm423_vm2, %v5467_v42 }
 0x12c   : > { %v3355_v49 = vsel %vm3353_vm4, %v3346_v48, %v3348_v47  ;;  %3504 = vmatprep.mubr.f32.mxu1 %v5763_v0 }
 0x12d   : > { %5475 = vmatprep.subr.msk.mxu0 %vm427_vm1, %v3355_v49  ;;  %v5516_v49 = vld [vmem:[%s6466_s2 + $0xb8] sm:$0xff] }
 0x12e   : > { %v3350_v50 = vpop.permute.xlu1 %3349 }
 0x12f   : > { %v3344_v51 = vpop.permute.xlu0 %3343  ;;  %v3356_v57 = vsel %vm3353_vm4, %v3348_v47, %v3350_v50 }
 0x130   : > { %v3354_v53 = vsel %vm3353_vm4, %v3344_v51, %v3346_v48 }
 0x131   : > { %5476 = vmatpush1.msk.msra.mxu0 %vm427_vm1, %v3354_v53 }
 0x132   : > { %v3520_v54 = vpop.permute.xlu1 %3519  ;;  %5477 = vmatmul.mubr.msk.f32.vlgmr.msra.gmra.mrb[0].mxu0 %vm423_vm2, %v5474_v52 }
 0x133   : > { %v3352_v55 = vpop.permute.xlu0 %3351  ;;  %3607 = vmatprep.mubr.f32.mxu0 %v5763_v0 }
 0x134   : > { %v3357_v56 = vsel %vm3353_vm4, %v3350_v50, %v3352_v55 }
 0x135   : > { %5478 = vmatprep.subr.msk.mxu1 %vm427_vm1, %v3357_v56 }
 0x136   : > { %5479 = vmatpush1.msk.msra.mxu1 %vm427_vm1, %v3356_v57  ;;  %v3518_v58 = vpop.permute.xlu1 %3517 }
 0x137   : > { %v3528_v59 = vsel %vm3527_vm5, %v3518_v58, %v3520_v54  ;;  %v3522_v60 = vpop.permute.xlu0 %3521  ;;  %5480 = vmatmul.mubr.msk.f32.vlgmr.msra.gmra.mrb[0].mxu1 %vm423_vm2, %v5474_v52 }
 0x138   : > { %v3529_v61 = vsel %vm3527_vm5, %v3520_v54, %v3522_v60  ;;  %3678 = vmatprep.mubr.f32.mxu1 %v5763_v0 }
 0x139   : > { %5482 = vmatprep.subr.msk.mxu0 %vm427_vm1, %v3529_v61 }
 0x13a   : > { %5483 = vmatpush1.msk.msra.mxu0 %vm427_vm1, %v3528_v59  ;;  %v3526_v63 = vpop.permute.xlu1 %3525  ;;  %v5523_v59 = vld [vmem:[%s6466_s2 + $0xc0] sm:$0xff] }
 0x13b   : > { %v3524_v2 = vpop.permute.xlu0 %3523  ;;  %5484 = vmatmul.mubr.msk.f32.vlgmr.msra.gmra.mrb[0].mxu0 %vm423_vm2, %v5481_v62 }
 0x13c   : > { %v3530_v5 = vsel %vm3527_vm5, %v3522_v60, %v3524_v2  ;;  %v3531_v7 = vsel %vm3527_vm5, %v3524_v2, %v3526_v63  ;;  %3781 = vmatprep.mubr.f32.mxu0 %v5763_v0 }
 0x13d   : > { %5485 = vmatprep.subr.msk.mxu1 %vm427_vm1, %v3531_v7 }
 0x13e   : > { %5486 = vmatpush1.msk.msra.mxu1 %vm427_vm1, %v3530_v5  ;;  %v3696_v9 = vpop.permute.xlu1 %3695 }
 0x13f   : > { %v3694_v10 = vpop.permute.xlu0 %3693  ;;  %5487 = vmatmul.mubr.msk.f32.vlgmr.msra.gmra.mrb[0].mxu1 %vm423_vm2, %v5481_v62 }
 0x140   : > { %v3703_v11 = vsel %vm3701_vm6, %v3694_v10, %v3696_v9  ;;  %3852 = vmatprep.mubr.f32.mxu1 %v5763_v0 }
 0x141   : > { %5489 = vmatprep.subr.msk.mxu0 %vm427_vm1, %v3703_v11  ;;  %v5530_v11 = vld [vmem:[%s6466_s2 + $0xc8] sm:$0xff] }
 0x142   : > { %v3698_v12 = vpop.permute.xlu1 %3697 }
 0x143   : > { %v3692_v13 = vpop.permute.xlu0 %3691  ;;  %v3704_v19 = vsel %vm3701_vm6, %v3696_v9, %v3698_v12 }
 0x144   : > { %v3702_v15 = vsel %vm3701_vm6, %v3692_v13, %v3694_v10 }
 0x145   : > { %5490 = vmatpush1.msk.msra.mxu0 %vm427_vm1, %v3702_v15 }
 0x146   : > { %v3868_v16 = vpop.permute.xlu1 %3867  ;;  %5491 = vmatmul.mubr.msk.f32.vlgmr.msra.gmra.mrb[0].mxu0 %vm423_vm2, %v5488_v14 }
 0x147   : > { %v3700_v17 = vpop.permute.xlu0 %3699  ;;  %3955 = vmatprep.mubr.f32.mxu0 %v5763_v0 }
 0x148   : > { %v3705_v18 = vsel %vm3701_vm6, %v3698_v12, %v3700_v17 }
 0x149   : > { %5492 = vmatprep.subr.msk.mxu1 %vm427_vm1, %v3705_v18 }
 0x14a   : > { %5493 = vmatpush1.msk.msra.mxu1 %vm427_vm1, %v3704_v19  ;;  %v3866_v20 = vpop.permute.xlu1 %3865 }
 0x14b   : > { %v3876_v21 = vsel %vm3875_vm7, %v3866_v20, %v3868_v16  ;;  %v3870_v22 = vpop.permute.xlu0 %3869  ;;  %5494 = vmatmul.mubr.msk.f32.vlgmr.msra.gmra.mrb[0].mxu1 %vm423_vm2, %v5488_v14 }
 0x14c   : > { %v3877_v23 = vsel %vm3875_vm7, %v3868_v16, %v3870_v22  ;;  %4026 = vmatprep.mubr.f32.mxu1 %v5763_v0 }
 0x14d   : > { %5496 = vmatprep.subr.msk.mxu0 %vm427_vm1, %v3877_v23 }
 0x14e   : > { %5497 = vmatpush1.msk.msra.mxu0 %vm427_vm1, %v3876_v21  ;;  %v3874_v25 = vpop.permute.xlu1 %3873  ;;  %v5537_v21 = vld [vmem:[%s6466_s2 + $0xd0] sm:$0xff] }
 0x14f   : > { %v3872_v26 = vpop.permute.xlu0 %3871  ;;  %5498 = vmatmul.mubr.msk.f32.vlgmr.msra.gmra.mrb[0].mxu0 %vm423_vm2, %v5495_v24 }
 0x150   : > { %v3878_v27 = vsel %vm3875_vm7, %v3870_v22, %v3872_v26  ;;  %v3879_v28 = vsel %vm3875_vm7, %v3872_v26, %v3874_v25  ;;  %4129 = vmatprep.mubr.f32.mxu0 %v5763_v0 }
 0x151   : > { %5499 = vmatprep.subr.msk.mxu1 %vm427_vm1, %v3879_v28  ;;  %v5085_v28 = vld [vmem:[%s366_s30] sm:$0xf] }
 0x152   : > { %5500 = vmatpush1.msk.msra.mxu1 %vm427_vm1, %v3878_v27  ;;  %v4044_v29 = vpop.permute.xlu1 %4043 }
 0x153   : > { %v4042_v30 = vpop.permute.xlu0 %4041  ;;  %5501 = vmatmul.mubr.msk.f32.vlgmr.msra.gmra.mrb[0].mxu1 %vm423_vm2, %v5495_v24 }
 0x154   : > { %v4051_v4 = vsel %vm4049_vm8, %v4042_v30, %v4044_v29  ;;  %4200 = vmatprep.mubr.f32.mxu1 %v5763_v0 }
 0x155   : > { %5503 = vmatprep.subr.msk.mxu0 %vm427_vm1, %v4051_v4 }
 0x156   : > { %v4046_v31 = vpop.permute.xlu1 %4045 }
 0x157   : > { %v4040_v32 = vpop.permute.xlu0 %4039  ;;  %v4052_v36 = vsel %vm4049_vm8, %v4044_v29, %v4046_v31 }
 0x158   : > { %v4050_v1 = vsel %vm4049_vm8, %v4040_v32, %v4042_v30 }
 0x159   : > { %5504 = vmatpush1.msk.msra.mxu0 %vm427_vm1, %v4050_v1 }
 0x15a   : > { %v4216_v3 = vpop.permute.xlu1 %4215  ;;  %5505 = vmatmul.mubr.msk.f32.vlgmr.msra.gmra.mrb[0].mxu0 %vm423_vm2, %v5502_v33 }
 0x15b   : > { %v4048_v34 = vpop.permute.xlu0 %4047  ;;  %4303 = vmatprep.mubr.f32.mxu0 %v5763_v0 }
 0x15c   : > { %v4053_v35 = vsel %vm4049_vm8, %v4046_v31, %v4048_v34 }
 0x15d   : > { %5506 = vmatprep.subr.msk.mxu1 %vm427_vm1, %v4053_v35 }
 0x15e   : > { %5507 = vmatpush1.msk.msra.mxu1 %vm427_vm1, %v4052_v36  ;;  %v4214_v8 = vpop.permute.xlu1 %4213 }
 0x15f   : > { %v4224_v6 = vsel %vm4223_vm9, %v4214_v8, %v4216_v3  ;;  %v4218_v37 = vpop.permute.xlu0 %4217  ;;  %5508 = vmatmul.mubr.msk.f32.vlgmr.msra.gmra.mrb[0].mxu1 %vm423_vm2, %v5502_v33 }
 0x160   : > { %v4225_v38 = vsel %vm4223_vm9, %v4216_v3, %v4218_v37  ;;  %4374 = vmatprep.mubr.f32.mxu1 %v5763_v0 }
 0x161   : > { %5510 = vmatprep.subr.msk.mxu0 %vm427_vm1, %v4225_v38 }
 0x162   : > { %5511 = vmatpush1.msk.msra.mxu0 %vm427_vm1, %v4224_v6  ;;  %v4222_v40 = vpop.permute.xlu1 %4221 }
 0x163   : > { %v4220_v41 = vpop.permute.xlu0 %4219  ;;  %5512 = vmatmul.mubr.msk.f32.vlgmr.msra.gmra.mrb[0].mxu0 %vm423_vm2, %v5509_v39 }
 0x164   : > { %v4226_v42 = vsel %vm4223_vm9, %v4218_v37, %v4220_v41  ;;  %v4227_v43 = vsel %vm4223_vm9, %v4220_v41, %v4222_v40  ;;  %4477 = vmatprep.mubr.f32.mxu0 %v5763_v0 }
 0x165   : > { %5513 = vmatprep.subr.msk.mxu1 %vm427_vm1, %v4227_v43 }
 0x166   : > { %5514 = vmatpush1.msk.msra.mxu1 %vm427_vm1, %v4226_v42  ;;  %v4392_v44 = vpop.permute.xlu1 %4391 }
 0x167   : > { %v4390_v45 = vpop.permute.xlu0 %4389  ;;  %5515 = vmatmul.mubr.msk.f32.vlgmr.msra.gmra.mrb[0].mxu1 %vm423_vm2, %v5509_v39 }
 0x168   : > { %v4399_v46 = vsel %vm4397_vm10, %v4390_v45, %v4392_v44  ;;  %4548 = vmatprep.mubr.f32.mxu1 %v5763_v0 }
 0x169   : > { %5517 = vmatprep.subr.msk.mxu0 %vm427_vm1, %v4399_v46 }
 0x16a   : > { %v4394_v47 = vpop.permute.xlu1 %4393 }
 0x16b   : > { %v4388_v48 = vpop.permute.xlu0 %4387  ;;  %v4400_v54 = vsel %vm4397_vm10, %v4392_v44, %v4394_v47 }
 0x16c   : > { %v4398_v50 = vsel %vm4397_vm10, %v4388_v48, %v4390_v45 }
 0x16d   : > { %5518 = vmatpush1.msk.msra.mxu0 %vm427_vm1, %v4398_v50 }
 0x16e   : > { %v4564_v51 = vpop.permute.xlu1 %4563  ;;  %5519 = vmatmul.mubr.msk.f32.vlgmr.msra.gmra.mrb[0].mxu0 %vm423_vm2, %v5516_v49 }
 0x16f   : > { %v4396_v52 = vpop.permute.xlu0 %4395  ;;  %4651 = vmatprep.mubr.f32.mxu0 %v5763_v0 }
 0x170   : > { %v4401_v53 = vsel %vm4397_vm10, %v4394_v47, %v4396_v52 }
 0x171   : > { %5520 = vmatprep.subr.msk.mxu1 %vm427_vm1, %v4401_v53 }
 0x172   : > { %5521 = vmatpush1.msk.msra.mxu1 %vm427_vm1, %v4400_v54  ;;  %v4562_v55 = vpop.permute.xlu1 %4561 }
 0x173   : > { %v4572_v56 = vsel %vm4571_vm11, %v4562_v55, %v4564_v51  ;;  %v4566_v57 = vpop.permute.xlu0 %4565  ;;  %5522 = vmatmul.mubr.msk.f32.vlgmr.msra.gmra.mrb[0].mxu1 %vm423_vm2, %v5516_v49 }
 0x174   : > { %v4573_v58 = vsel %vm4571_vm11, %v4564_v51, %v4566_v57  ;;  %4722 = vmatprep.mubr.f32.mxu1 %v5763_v0 }
 0x175   : > { %5524 = vmatprep.subr.msk.mxu0 %vm427_vm1, %v4573_v58 }
 0x176   : > { %5525 = vmatpush1.msk.msra.mxu0 %vm427_vm1, %v4572_v56  ;;  %v4570_v60 = vpop.permute.xlu1 %4569 }
 0x177   : > { %v4568_v61 = vpop.permute.xlu0 %4567  ;;  %5526 = vmatmul.mubr.msk.f32.vlgmr.msra.gmra.mrb[0].mxu0 %vm423_vm2, %v5523_v59 }
 0x178   : > { %v4574_v62 = vsel %vm4571_vm11, %v4566_v57, %v4568_v61  ;;  %v4575_v63 = vsel %vm4571_vm11, %v4568_v61, %v4570_v60  ;;  %4825 = vmatprep.mubr.f32.mxu0 %v5763_v0 }
 0x179   : > { %5527 = vmatprep.subr.msk.mxu1 %vm427_vm1, %v4575_v63 }
 0x17a   : > { %5528 = vmatpush1.msk.msra.mxu1 %vm427_vm1, %v4574_v62  ;;  %v4740_v2 = vpop.permute.xlu1 %4739 }
 0x17b   : > { %v4738_v5 = vpop.permute.xlu0 %4737  ;;  %5529 = vmatmul.mubr.msk.f32.vlgmr.msra.gmra.mrb[0].mxu1 %vm423_vm2, %v5523_v59 }
 0x17c   : > { %v4747_v7 = vsel %vm4745_vm12, %v4738_v5, %v4740_v2  ;;  %4896 = vmatprep.mubr.f32.mxu1 %v5763_v0 }
 0x17d   : > { %5531 = vmatprep.subr.msk.mxu0 %vm427_vm1, %v4747_v7 }
 0x17e   : > { %v4742_v9 = vpop.permute.xlu1 %4741 }
 0x17f   : > { %v4736_v10 = vpop.permute.xlu0 %4735  ;;  %v4748_v16 = vsel %vm4745_vm12, %v4740_v2, %v4742_v9 }
 0x180   : > { %v4746_v12 = vsel %vm4745_vm12, %v4736_v10, %v4738_v5 }
 0x181   : > { %5532 = vmatpush1.msk.msra.mxu0 %vm427_vm1, %v4746_v12 }
 0x182   : > { %v4912_v13 = vpop.permute.xlu1 %4911  ;;  %5533 = vmatmul.mubr.msk.f32.vlgmr.msra.gmra.mrb[0].mxu0 %vm423_vm2, %v5530_v11 }
 0x183   : > { %v4744_v14 = vpop.permute.xlu0 %4743  ;;  %4999 = vmatprep.mubr.f32.mxu0 %v5763_v0 }
 0x184   : > { %v4749_v15 = vsel %vm4745_vm12, %v4742_v9, %v4744_v14 }
 0x185   : > { %5534 = vmatprep.subr.msk.mxu1 %vm427_vm1, %v4749_v15 }
 0x186   : > { %5535 = vmatpush1.msk.msra.mxu1 %vm427_vm1, %v4748_v16  ;;  %v4910_v17 = vpop.permute.xlu1 %4909 }
 0x187   : > { %v4920_v18 = vsel %vm4919_vm13, %v4910_v17, %v4912_v13  ;;  %5536 = vmatmul.mubr.msk.f32.vlgmr.msra.gmra.mrb[0].mxu1 %vm423_vm2, %v5530_v11  ;;  %v4914_v19 = vpop.permute.xlu0 %4913 }
 0x188   : > { %v4921_v20 = vsel %vm4919_vm13, %v4912_v13, %v4914_v19  ;;  %5070 = vmatprep.mubr.f32.mxu1 %v5763_v0  ;;  %v5087_v0 = vlaneseq }
 0x189   : > { %5538 = vmatprep.subr.msk.mxu0 %vm427_vm1, %v4921_v20 }
 0x18a   : > { %5539 = vmatpush1.msk.msra.mxu0 %vm427_vm1, %v4920_v18  ;;  %v4918_v22 = vpop.permute.xlu1 %4917  ;;  %v5088_v26 = vshrl.u32 %v5087_v0, 7 }
 0x18b   : > { %5540 = vmatmul.mubr.msk.f32.vlgmr.msra.gmra.mrb[0].mxu0 %vm423_vm2, %v5537_v21  ;;  %v4916_v23 = vpop.permute.xlu0 %4915 }
 0x18c   : > { %v4922_v24 = vsel %vm4919_vm13, %v4914_v19, %v4916_v23  ;;  %v4923_v25 = vsel %vm4919_vm13, %v4916_v23, %v4918_v22  ;;  %v5089_v27 = vsub.s32 0, %v5088_v26  ;;  %v5093_v29 = vsub.s32 1, %v5088_v26 }
 0x18d   : > { %5541 = vmatprep.subr.msk.mxu1 %vm427_vm1, %v4923_v25  ;;  %v5097_v4 = vsub.s32 2, %v5088_v26  ;;  %v5101_v32 = vsub.s32 3, %v5088_v26 }
 0x18e   : > { %5542 = vmatpush1.msk.msra.mxu1 %vm427_vm1, %v4922_v24  ;;  %v5090_v30 = vrot.slane %v5085_v28, %v5089_v27  ;;  %v5094_v31 = vrot.slane %v5085_v28, %v5093_v29  ;;  %vm5116_vm1 = vcmask 7168  }
 0x18f   : > { %5543 = vmatmul.mubr.msk.f32.vlgmr.msra.gmra.mrb[0].mxu1 %vm423_vm2, %v5537_v21  ;;  %v5098_v34 = vrot.slane %v5085_v28, %v5097_v4  ;;  %v5102_v36 = vrot.slane %v5085_v28, %v5101_v32 }
 0x25e   : > { %v5001_v33 = vpop.f32.mrb[0].mxu0 }
 0x25f   : > { %5081 = vst [vmem:[%s376_s11] sm:$0xff] %v5001_v33  ;;  %v5107_v1 = vmul.f32 %v5090_v30, %v5001_v33  ;;  %v5003_v3 = vpop.f32.mrb[1].mxu0 }
 0x260   : > { %5082 = vst [vmem:[%s376_s11 + $0x8] sm:$0xff] %v5003_v3  ;;  %v5108_v35 = vmul.f32 %v5094_v31, %v5003_v3 }
 0x261   : > { %v5118_v8 = vmul.f32 %v5107_v1, %v5001_v33 }
 0x262   : > { %v5111_v6 = vadd.f32 %v5108_v35, %v5107_v1  ;;  %v5119_v37 = vmul.f32 %v5108_v35, %v5003_v3  ;;  %v5072_v38 = vpop.f32.mrb[0].mxu1 }
 0x263   : > { %5083 = vst [vmem:[%s376_s11 + $0x10] sm:$0xff] %v5072_v38  ;;  %v5109_v39 = vmul.f32 %v5098_v34, %v5072_v38  ;;  %v5074_v40 = vpop.f32.mrb[1].mxu1 }
 0x264   : > { %v5122_v41 = vadd.f32 %v5119_v37, %v5118_v8  ;;  %5084 = vst [vmem:[%s376_s11 + $0x18] sm:$0xff] %v5074_v40  ;;  %v5110_v42 = vmul.f32 %v5102_v36, %v5074_v40 }
 0x265   : > { %v5112_v43 = vadd.f32 %v5111_v6, %v5109_v39  ;;  %v5120_v44 = vmul.f32 %v5109_v39, %v5072_v38 }
 0x266   : > { %v5121_v45 = vmul.f32 %v5110_v42, %v5074_v40 }
 0x267   : > { %v5123_v46 = vadd.f32 %v5122_v41, %v5120_v44  ;;  %v5113_v47 = vadd.f32 %v5112_v43, %v5110_v42 }
 0x269   : > { %v5124_v48 = vadd.f32 %v5123_v46, %v5121_v45  ;;  %5114 = vadd.xlane.f32.xlu0 %v5113_v47 }
 0x26b   : > { %5125 = vadd.xlane.f32.xlu1 %v5124_v48 }
 0x2f6   : > { %v5115_v49 = vpop.xlane.xlu0 %5114 }
 0x2f7   : > { %5117 = vst.msk [vmem:[%s385_s16] sm:$0xff] %vm5116_vm1, %v5115_v49 }
 0x2f8   : > { %v5126_v50 = vpop.xlane.xlu1 %5125 }
 0x2f9   : > { %5127 = vst.msk [vmem:[%s393_s18] sm:$0xff] %vm5116_vm1, %v5126_v50 }
 0x2fa PF: > { %s17_s25 = sadd.s32 1, %s5761_s25   ;;  %s6471_s21 = smov %s5753_s23 }
 0x2fb   : > { %p14_p10 = scmp.ge.s32.totalorder %s17_s25, 10   ;;  %s6472_s22 = smov %s5757_s24 }
 0x2fc   : > { %s6473_s23 = smov %s6476_s26  ;;  %s6474_s24 = smov %s6480_s27 }
 0x2fd   :  { %16 = sbr.rel (!%p14_p10) target bundleno = 3 (0x3), region = 122 }

</bundles_post_ra>
